<compile_context>
chip_gen: v5e
topology: v5e:2x2
jax: 0.10.0
libtpu: 0.0.40
codegen_flags: <defaults>
</compile_context>

<pallas_src>
import functools

import numpy as np
import jax
import jax.numpy as jnp
from jax.experimental import pallas as pl
from jax.experimental.pallas import tpu as pltpu


# ----------------------------- GELU -------------------------------------------
def _gelu(x):
    # tanh-form GELU (EUP tanh instead of a VALU-heavy rational erf).
    # TODO(synk): torch.nn.GELU defaults to the exact erf form; swap in lax.erf
    # here if bit-level parity with the PyTorch reference is required.
    c = 0.7978845608028654  # sqrt(2/pi)
    return 0.5 * x * (1.0 + jnp.tanh(c * (x + 0.044715 * x * x * x)))


# ----------------------------- fused kernel ------------------------------------
def _cell_kernel(x_ref, wstk_ref, bproj_ref, mask_ref, sel_ref, gt_ref,
                 wdw_ref, mt_ref, wout_ref, bout_ref, out_ref,
                 taps_ref, cat_ref, *, width, cc):
    # x_ref:    (bb, dim, HW) f32    -- block of input images (spatial on lanes)
    # wstk_ref: (dim, 9*dim)  bf16   -- 3x3 weights stacked along contraction
    # mask_ref: (9, 1, HW)    f32    -- per-tap zero-padding validity masks
    # sel_ref:  (HW, P)       bf16   -- 0/1 anchor selection (8x8 pool compaction)
    # gt_ref:   (9, P, P)     bf16   -- low-res depthwise-3x3 gather matrices
    # wdw_ref:  (9, cc, 1)    f32    -- depthwise weights per tap/channel
    # mt_ref:   (P, HW)       bf16   -- bilinear upsample matrix
    # taps_ref: (9*dim, HW)   bf16   -- VMEM scratch: stacked conv taps
    # cat_ref:  (dim, HW)     bf16   -- VMEM scratch: gelu([x1; x2]) operand
    f32 = jnp.float32
    bf16 = jnp.bfloat16
    bb, dim, hw = x_ref.shape
    dmc = dim - cc

    # Hoist all constant loads out of the batch loop (JAX does not CSE these).
    wstk = wstk_ref[...]
    bproj = bproj_ref[...]
    masks = mask_ref[...]
    sel = sel_ref[...]
    gts = gt_ref[...]
    wdws = wdw_ref[...]
    mt = mt_ref[...]
    wout = wout_ref[...]
    bout = bout_ref[...]

    for b in range(bb):                         # small static block: unrolled
        x = x_ref[b]                            # (dim, HW) f32

        # ---- 3x3 proj conv: 9 rolled+masked taps -> ONE 72-deep MXU matmul ----
        for kh in range(3):
            for kw in range(3):
                k = kh * 3 + kw
                d = (kh - 1) * width + (kw - 1)       # tap at j reads x[j + d]
                if d == 0:
                    xs = x                            # centre tap: no shift/mask
                else:
                    xs = pltpu.roll(x, (hw - d) % hw, axis=1) * masks[k]
                taps_ref[k * dim:(k + 1) * dim, :] = xs.astype(bf16)
        acc = jnp.dot(wstk, taps_ref[...], preferred_element_type=f32) + bproj
        x0 = acc[:cc, :]                        # (cc, HW)
        x1 = acc[cc:, :]                        # (dim-cc, HW)

        # ---- 8x8 window max pool (== adaptive_max_pool2d to (H/8, W/8)):
        #      hierarchical roll-max, then a 0/1 anchor-selection matmul ----
        z = x0
        for s in (1, 2, 4):                           # max over 8 columns
            z = jnp.maximum(z, pltpu.roll(z, hw - s, axis=1))
        for s in (width, 2 * width, 4 * width):       # max over 8 rows
            z = jnp.maximum(z, pltpu.roll(z, hw - s, axis=1))
        pooled = jnp.dot(z.astype(bf16), sel, preferred_element_type=f32)

        # ---- depthwise 3x3 at LOW resolution (9 tiny (P,P) matmuls) ----
        pooled_b = pooled.astype(bf16)
        u = jnp.zeros_like(pooled)                    # (cc, P) f32
        for k in range(9):
            u = u + jnp.dot(pooled_b, gts[k], preferred_element_type=f32) * wdws[k]

        # ---- bilinear upsample back to full res: one (cc,P)@(P,HW) matmul ----
        t = jnp.dot(u.astype(bf16), mt, preferred_element_type=f32)
        x2 = _gelu(t) * x0

        # ---- out = 1x1conv(gelu(cat[x1, x2])): ONE (dim,dim)@(dim,HW) matmul ----
        cat_ref[:dmc, :] = _gelu(x1).astype(bf16)
        cat_ref[dmc:, :] = _gelu(x2).astype(bf16)
        out_ref[b] = jnp.dot(wout, cat_ref[...], preferred_element_type=f32) + bout


# ----------------------------- constant matrices (numpy glue) ------------------
def _bilinear_matrix(out_size, in_size):
    # F.interpolate(mode='bilinear', align_corners=False) weights.
    scale = in_size / out_size
    m = np.zeros((out_size, in_size), np.float32)
    for d in range(out_size):
        src = scale * (d + 0.5) - 0.5
        if src < 0.0:
            src = 0.0
        i0 = min(int(np.floor(src)), in_size - 1)
        i1 = min(i0 + 1, in_size - 1)
        frac = src - i0
        m[d, i0] += 1.0 - frac
        m[d, i1] += frac
    return m


def _dw_gather_matrices(h8, w8):
    # G[k, p, q] = 1 if low-res output pixel p reads input pixel q for tap k.
    p = h8 * w8
    g = np.zeros((9, p, p), np.float32)
    for kh in range(3):
        for kw in range(3):
            k = kh * 3 + kw
            for i in range(h8):
                for j in range(w8):
                    ii, jj = i + kh - 1, j + kw - 1
                    if 0 <= ii < h8 and 0 <= jj < w8:
                        g[k, i * w8 + j, ii * w8 + jj] = 1.0
    return g


def _pool_select_matrix(h, w):
    # S[s, p] = 1 iff flattened position s is the anchor of 8x8 window p.
    h8, w8 = h // 8, w // 8
    s = np.zeros((h * w, h8 * w8), np.float32)
    for ri in range(h8):
        for ci in range(w8):
            s[(ri * 8) * w + ci * 8, ri * w8 + ci] = 1.0
    return s


def _conv_tap_masks(h, w):
    # mask[k, 0, j] = 1 iff output position j has an in-bounds source pixel for
    # 3x3 tap k (zero 'same' padding): zeroes the values pltpu.roll wraps in.
    hw = h * w
    row = np.arange(hw) // w
    col = np.arange(hw) % w
    m = np.ones((9, 1, hw), np.float32)
    for kh in range(3):
        for kw in range(3):
            k = kh * 3 + kw
            v = np.ones(hw, np.float32)
            if kh == 0:
                v *= (row > 0)
            if kh == 2:
                v *= (row < h - 1)
            if kw == 0:
                v *= (col > 0)
            if kw == 2:
                v *= (col < w - 1)
            m[k, 0] = v
    return m


def _pick_batch_block(n, dim, hw):
    # Amortize the ~0.35us per-grid-step overhead over a few images while the
    # f32 input+output blocks stay small; must divide the batch.
    per_image = 2 * dim * hw * 4
    bb = int(max(1, min(n, 8, (4 << 20) // max(per_image, 1))))
    while n % bb:
        bb -= 1
    return bb


# ----------------------------- parameters --------------------------------------
def init_cell_params(key, dim, ratio=4):
    cc = dim // ratio
    ks = jax.random.split(key, 5)
    return {
        'dim': dim,
        'chunk_dim': cc,
        'w_proj': jax.random.normal(ks[0], (dim, dim, 3, 3), jnp.float32) * 0.1,
        'b_proj': jax.random.normal(ks[1], (dim,), jnp.float32) * 0.1,
        'w_dw': jax.random.normal(ks[2], (cc, 1, 3, 3), jnp.float32) * 0.1,
        'w_out': jax.random.normal(ks[3], (dim, dim, 1, 1), jnp.float32) * 0.1,
        'b_out': jax.random.normal(ks[4], (dim,), jnp.float32) * 0.1,
    }


# ----------------------------- forward ------------------------------------------
def cell_forward(x_nchw, params):
    n, dim, h, w = x_nchw.shape
    cc = params['chunk_dim']
    assert dim == params['dim']
    assert h % 8 == 0 and w % 8 == 0, \
        "adaptive pool == 8x8 window pool requires H, W % 8 == 0"
    h8, w8 = h // 8, w // 8
    p = h8 * w8
    hw = h * w
    bf16 = jnp.bfloat16
    f32 = jnp.float32

    x = x_nchw.reshape(n, dim, hw)          # metadata-only reshape, stays f32

    # 3x3 weights stacked along contraction: Wstk[o, k*dim + i] = w[o, i, kh, kw]
    wstk = (jnp.transpose(params['w_proj'], (0, 2, 3, 1))
            .reshape(dim, 9 * dim).astype(bf16))
    bproj = params['b_proj'].reshape(dim, 1).astype(f32)
    masks = jnp.asarray(_conv_tap_masks(h, w))                                    # (9,1,HW)

    sel = jnp.asarray(_pool_select_matrix(h, w), bf16)                            # (HW, P)
    gt = jnp.asarray(np.transpose(_dw_gather_matrices(h8, w8), (0, 2, 1)), bf16)  # (9,P,P)
    wdw9 = (jnp.transpose(params['w_dw'][:, 0].reshape(cc, 9), (1, 0))
            .reshape(9, cc, 1).astype(f32))
    mt = jnp.asarray(np.kron(_bilinear_matrix(h, h8), _bilinear_matrix(w, w8)).T,
                     bf16)                                                        # (P, HW)
    wout = params['w_out'][:, :, 0, 0].astype(bf16)                               # (dim, dim)
    bout = params['b_out'].reshape(dim, 1).astype(f32)

    bb = _pick_batch_block(n, dim, hw)

    out = pl.pallas_call(
        functools.partial(_cell_kernel, width=w, cc=cc),
        grid=(n // bb,),
        in_specs=[
            pl.BlockSpec((bb, dim, hw), lambda b: (b, 0, 0)),
            pl.BlockSpec((dim, 9 * dim), lambda b: (0, 0)),
            pl.BlockSpec((dim, 1), lambda b: (0, 0)),
            pl.BlockSpec((9, 1, hw), lambda b: (0, 0, 0)),
            pl.BlockSpec((hw, p), lambda b: (0, 0)),
            pl.BlockSpec((9, p, p), lambda b: (0, 0, 0)),
            pl.BlockSpec((9, cc, 1), lambda b: (0, 0, 0)),
            pl.BlockSpec((p, hw), lambda b: (0, 0)),
            pl.BlockSpec((dim, dim), lambda b: (0, 0)),
            pl.BlockSpec((dim, 1), lambda b: (0, 0)),
        ],
        out_specs=pl.BlockSpec((bb, dim, hw), lambda b: (b, 0, 0)),
        out_shape=jax.ShapeDtypeStruct((n, dim, hw), f32),
        scratch_shapes=[pltpu.VMEM((9 * dim, hw), bf16),   # stacked conv taps
                        pltpu.VMEM((dim, hw), bf16)],      # gelu([x1; x2])
        compiler_params=pltpu.CompilerParams(
            dimension_semantics=("parallel",)),
    )(x, wstk, bproj, masks, sel, gt, wdw9, mt, wout, bout)

    return out.reshape(n, dim, h, w)        # already NCHW, no transpose


if __name__ == "__main__":
    dim, ratio = 8, 4
    n, h, w = 2, 16, 16
    key = jax.random.PRNGKey(0)
    kp, kx = jax.random.split(key)
    params = init_cell_params(kp, dim, ratio)
    x = jax.random.normal(kx, (n, dim, h, w), jnp.float32)

    out = cell_forward(x, params)
    jax.block_until_ready(out)
    assert out.shape == (n, dim, h, w)
    assert bool(jnp.all(jnp.isfinite(out)))
    print("KERNEL_OK")
</pallas_src>

<mosaic_0001>
module attributes {stable_mosaic.version = 11 : i64} {
  func.func @_cell_kernel(%arg0: i32, %arg1: memref<2x8x256xf32, #tpu.memory_space<vmem>>, %arg2: memref<8x72xbf16, #tpu.memory_space<vmem>>, %arg3: memref<8x1xf32, #tpu.memory_space<vmem>>, %arg4: memref<9x1x256xf32, #tpu.memory_space<vmem>>, %arg5: memref<256x4xbf16, #tpu.memory_space<vmem>>, %arg6: memref<9x4x4xbf16, #tpu.memory_space<vmem>>, %arg7: memref<9x2x1xf32, #tpu.memory_space<vmem>>, %arg8: memref<4x256xbf16, #tpu.memory_space<vmem>>, %arg9: memref<8x8xbf16, #tpu.memory_space<vmem>>, %arg10: memref<8x1xf32, #tpu.memory_space<vmem>>, %arg11: memref<2x8x256xf32, #tpu.memory_space<vmem>>, %arg12: memref<72x256xbf16, #tpu.memory_space<vmem>>, %arg13: memref<8x256xbf16, #tpu.memory_space<vmem>>) attributes {dimension_semantics = [#tpu.dimension_semantics<parallel>], iteration_bounds = array<i64: 1>, scalar_prefetch = 0 : i64, scratch_operands = 2 : i64, tpu.core_type = #tpu.core_type<tc>, window_params = [{transform_indices = @transform_0, window_bounds = array<i64: 2, 8, 256>}, {pipeline_mode = #tpu.pipeline_mode<synchronous>, transform_indices = @transform_1, window_bounds = array<i64: 8, 72>}, {pipeline_mode = #tpu.pipeline_mode<synchronous>, transform_indices = @transform_2, window_bounds = array<i64: 8, 1>}, {pipeline_mode = #tpu.pipeline_mode<synchronous>, transform_indices = @transform_3, window_bounds = array<i64: 9, 1, 256>}, {pipeline_mode = #tpu.pipeline_mode<synchronous>, transform_indices = @transform_4, window_bounds = array<i64: 256, 4>}, {pipeline_mode = #tpu.pipeline_mode<synchronous>, transform_indices = @transform_5, window_bounds = array<i64: 9, 4, 4>}, {pipeline_mode = #tpu.pipeline_mode<synchronous>, transform_indices = @transform_6, window_bounds = array<i64: 9, 2, 1>}, {pipeline_mode = #tpu.pipeline_mode<synchronous>, transform_indices = @transform_7, window_bounds = array<i64: 4, 256>}, {pipeline_mode = #tpu.pipeline_mode<synchronous>, transform_indices = @transform_8, window_bounds = array<i64: 8, 8>}, {pipeline_mode = #tpu.pipeline_mode<synchronous>, transform_indices = @transform_9, window_bounds = array<i64: 8, 1>}, {transform_indices = @transform_10, window_bounds = array<i64: 2, 8, 256>}]} {
    %c0 = arith.constant 0 : index
    %c0_0 = arith.constant 0 : index
    %0 = vector.load %arg2[%c0, %c0_0] : memref<8x72xbf16, #tpu.memory_space<vmem>>, vector<8x72xbf16>
    %c0_1 = arith.constant 0 : index
    %c0_2 = arith.constant 0 : index
    %1 = vector.load %arg3[%c0_1, %c0_2] : memref<8x1xf32, #tpu.memory_space<vmem>>, vector<8x1xf32>
    %c0_3 = arith.constant 0 : index
    %c0_4 = arith.constant 0 : index
    %c0_5 = arith.constant 0 : index
    %2 = vector.load %arg4[%c0_3, %c0_4, %c0_5] : memref<9x1x256xf32, #tpu.memory_space<vmem>>, vector<9x1x256xf32>
    %c0_6 = arith.constant 0 : index
    %c0_7 = arith.constant 0 : index
    %3 = vector.load %arg5[%c0_6, %c0_7] : memref<256x4xbf16, #tpu.memory_space<vmem>>, vector<256x4xbf16>
    %c0_8 = arith.constant 0 : index
    %c0_9 = arith.constant 0 : index
    %c0_10 = arith.constant 0 : index
    %4 = vector.load %arg6[%c0_8, %c0_9, %c0_10] : memref<9x4x4xbf16, #tpu.memory_space<vmem>>, vector<9x4x4xbf16>
    %c0_11 = arith.constant 0 : index
    %c0_12 = arith.constant 0 : index
    %c0_13 = arith.constant 0 : index
    %5 = vector.load %arg7[%c0_11, %c0_12, %c0_13] : memref<9x2x1xf32, #tpu.memory_space<vmem>>, vector<9x2x1xf32>
    %c0_14 = arith.constant 0 : index
    %c0_15 = arith.constant 0 : index
    %6 = vector.load %arg8[%c0_14, %c0_15] : memref<4x256xbf16, #tpu.memory_space<vmem>>, vector<4x256xbf16>
    %c0_16 = arith.constant 0 : index
    %c0_17 = arith.constant 0 : index
    %7 = vector.load %arg9[%c0_16, %c0_17] : memref<8x8xbf16, #tpu.memory_space<vmem>>, vector<8x8xbf16>
    %c0_18 = arith.constant 0 : index
    %c0_19 = arith.constant 0 : index
    %8 = vector.load %arg10[%c0_18, %c0_19] : memref<8x1xf32, #tpu.memory_space<vmem>>, vector<8x1xf32>
    %c0_20 = arith.constant 0 : index
    %c0_21 = arith.constant 0 : index
    %c0_22 = arith.constant 0 : index
    %9 = vector.load %arg1[%c0_20, %c0_21, %c0_22] : memref<2x8x256xf32, #tpu.memory_space<vmem>>, vector<1x8x256xf32>
    %10 = vector.shape_cast %9 : vector<1x8x256xf32> to vector<8x256xf32>
    %c17_i32 = arith.constant 17 : i32
    %11 = tpu.dynamic_rotate %10 by %c17_i32 dim 1 : vector<8x256xf32>, i32 -> vector<8x256xf32>
    %12 = vector.extract_strided_slice %2 {offsets = [0, 0, 0], sizes = [1, 1, 256], strides = [1, 1, 1]} : vector<9x1x256xf32> to vector<1x1x256xf32>
    %13 = vector.shape_cast %12 : vector<1x1x256xf32> to vector<1x256xf32>
    %14 = vector.broadcast %13 : vector<1x256xf32> to vector<8x256xf32>
    %15 = arith.mulf %11, %14 : vector<8x256xf32>
    %16 = arith.truncf %15 : vector<8x256xf32> to vector<8x256xbf16>
    %c0_23 = arith.constant 0 : index
    %c0_24 = arith.constant 0 : index
    %17 = vector.load %arg12[%c0_23, %c0_24] : memref<72x256xbf16, #tpu.memory_space<vmem>>, vector<8x256xbf16>
    tpu.vector_store %arg12[%c0_23, %c0_24], %16 {strides = array<i32>} : memref<72x256xbf16, #tpu.memory_space<vmem>>, vector<8x256xbf16>,
    %c16_i32 = arith.constant 16 : i32
    %18 = tpu.dynamic_rotate %10 by %c16_i32 dim 1 : vector<8x256xf32>, i32 -> vector<8x256xf32>
    %19 = vector.extract_strided_slice %2 {offsets = [1, 0, 0], sizes = [1, 1, 256], strides = [1, 1, 1]} : vector<9x1x256xf32> to vector<1x1x256xf32>
    %20 = vector.shape_cast %19 : vector<1x1x256xf32> to vector<1x256xf32>
    %21 = vector.broadcast %20 : vector<1x256xf32> to vector<8x256xf32>
    %22 = arith.mulf %18, %21 : vector<8x256xf32>
    %23 = arith.truncf %22 : vector<8x256xf32> to vector<8x256xbf16>
    %c8 = arith.constant 8 : index
    %c0_25 = arith.constant 0 : index
    %24 = vector.load %arg12[%c8, %c0_25] : memref<72x256xbf16, #tpu.memory_space<vmem>>, vector<8x256xbf16>
    tpu.vector_store %arg12[%c8, %c0_25], %23 {strides = array<i32>} : memref<72x256xbf16, #tpu.memory_space<vmem>>, vector<8x256xbf16>,
    %c15_i32 = arith.constant 15 : i32
    %25 = tpu.dynamic_rotate %10 by %c15_i32 dim 1 : vector<8x256xf32>, i32 -> vector<8x256xf32>
    %26 = vector.extract_strided_slice %2 {offsets = [2, 0, 0], sizes = [1, 1, 256], strides = [1, 1, 1]} : vector<9x1x256xf32> to vector<1x1x256xf32>
    %27 = vector.shape_cast %26 : vector<1x1x256xf32> to vector<1x256xf32>
    %28 = vector.broadcast %27 : vector<1x256xf32> to vector<8x256xf32>
    %29 = arith.mulf %25, %28 : vector<8x256xf32>
    %30 = arith.truncf %29 : vector<8x256xf32> to vector<8x256xbf16>
    %c16 = arith.constant 16 : index
    %c0_26 = arith.constant 0 : index
    %31 = vector.load %arg12[%c16, %c0_26] : memref<72x256xbf16, #tpu.memory_space<vmem>>, vector<8x256xbf16>
    tpu.vector_store %arg12[%c16, %c0_26], %30 {strides = array<i32>} : memref<72x256xbf16, #tpu.memory_space<vmem>>, vector<8x256xbf16>,
    %c1_i32 = arith.constant 1 : i32
    %32 = tpu.dynamic_rotate %10 by %c1_i32 dim 1 : vector<8x256xf32>, i32 -> vector<8x256xf32>
    %33 = vector.extract_strided_slice %2 {offsets = [3, 0, 0], sizes = [1, 1, 256], strides = [1, 1, 1]} : vector<9x1x256xf32> to vector<1x1x256xf32>
    %34 = vector.shape_cast %33 : vector<1x1x256xf32> to vector<1x256xf32>
    %35 = vector.broadcast %34 : vector<1x256xf32> to vector<8x256xf32>
    %36 = arith.mulf %32, %35 : vector<8x256xf32>
    %37 = arith.truncf %36 : vector<8x256xf32> to vector<8x256xbf16>
    %c24 = arith.constant 24 : index
    %c0_27 = arith.constant 0 : index
    %38 = vector.load %arg12[%c24, %c0_27] : memref<72x256xbf16, #tpu.memory_space<vmem>>, vector<8x256xbf16>
    tpu.vector_store %arg12[%c24, %c0_27], %37 {strides = array<i32>} : memref<72x256xbf16, #tpu.memory_space<vmem>>, vector<8x256xbf16>,
    %39 = arith.truncf %10 : vector<8x256xf32> to vector<8x256xbf16>
    %c32 = arith.constant 32 : index
    %c0_28 = arith.constant 0 : index
    %40 = vector.load %arg12[%c32, %c0_28] : memref<72x256xbf16, #tpu.memory_space<vmem>>, vector<8x256xbf16>
    tpu.vector_store %arg12[%c32, %c0_28], %39 {strides = array<i32>} : memref<72x256xbf16, #tpu.memory_space<vmem>>, vector<8x256xbf16>,
    %c255_i32 = arith.constant 255 : i32
    %41 = tpu.dynamic_rotate %10 by %c255_i32 dim 1 : vector<8x256xf32>, i32 -> vector<8x256xf32>
    %42 = vector.extract_strided_slice %2 {offsets = [5, 0, 0], sizes = [1, 1, 256], strides = [1, 1, 1]} : vector<9x1x256xf32> to vector<1x1x256xf32>
    %43 = vector.shape_cast %42 : vector<1x1x256xf32> to vector<1x256xf32>
    %44 = vector.broadcast %43 : vector<1x256xf32> to vector<8x256xf32>
    %45 = arith.mulf %41, %44 : vector<8x256xf32>
    %46 = arith.truncf %45 : vector<8x256xf32> to vector<8x256xbf16>
    %c40 = arith.constant 40 : index
    %c0_29 = arith.constant 0 : index
    %47 = vector.load %arg12[%c40, %c0_29] : memref<72x256xbf16, #tpu.memory_space<vmem>>, vector<8x256xbf16>
    tpu.vector_store %arg12[%c40, %c0_29], %46 {strides = array<i32>} : memref<72x256xbf16, #tpu.memory_space<vmem>>, vector<8x256xbf16>,
    %c241_i32 = arith.constant 241 : i32
    %48 = tpu.dynamic_rotate %10 by %c241_i32 dim 1 : vector<8x256xf32>, i32 -> vector<8x256xf32>
    %49 = vector.extract_strided_slice %2 {offsets = [6, 0, 0], sizes = [1, 1, 256], strides = [1, 1, 1]} : vector<9x1x256xf32> to vector<1x1x256xf32>
    %50 = vector.shape_cast %49 : vector<1x1x256xf32> to vector<1x256xf32>
    %51 = vector.broadcast %50 : vector<1x256xf32> to vector<8x256xf32>
    %52 = arith.mulf %48, %51 : vector<8x256xf32>
    %53 = arith.truncf %52 : vector<8x256xf32> to vector<8x256xbf16>
    %c48 = arith.constant 48 : index
    %c0_30 = arith.constant 0 : index
    %54 = vector.load %arg12[%c48, %c0_30] : memref<72x256xbf16, #tpu.memory_space<vmem>>, vector<8x256xbf16>
    tpu.vector_store %arg12[%c48, %c0_30], %53 {strides = array<i32>} : memref<72x256xbf16, #tpu.memory_space<vmem>>, vector<8x256xbf16>,
    %c240_i32 = arith.constant 240 : i32
    %55 = tpu.dynamic_rotate %10 by %c240_i32 dim 1 : vector<8x256xf32>, i32 -> vector<8x256xf32>
    %56 = vector.extract_strided_slice %2 {offsets = [7, 0, 0], sizes = [1, 1, 256], strides = [1, 1, 1]} : vector<9x1x256xf32> to vector<1x1x256xf32>
    %57 = vector.shape_cast %56 : vector<1x1x256xf32> to vector<1x256xf32>
    %58 = vector.broadcast %57 : vector<1x256xf32> to vector<8x256xf32>
    %59 = arith.mulf %55, %58 : vector<8x256xf32>
    %60 = arith.truncf %59 : vector<8x256xf32> to vector<8x256xbf16>
    %c56 = arith.constant 56 : index
    %c0_31 = arith.constant 0 : index
    %61 = vector.load %arg12[%c56, %c0_31] : memref<72x256xbf16, #tpu.memory_space<vmem>>, vector<8x256xbf16>
    tpu.vector_store %arg12[%c56, %c0_31], %60 {strides = array<i32>} : memref<72x256xbf16, #tpu.memory_space<vmem>>, vector<8x256xbf16>,
    %c239_i32 = arith.constant 239 : i32
    %62 = tpu.dynamic_rotate %10 by %c239_i32 dim 1 : vector<8x256xf32>, i32 -> vector<8x256xf32>
    %63 = vector.extract_strided_slice %2 {offsets = [8, 0, 0], sizes = [1, 1, 256], strides = [1, 1, 1]} : vector<9x1x256xf32> to vector<1x1x256xf32>
    %64 = vector.shape_cast %63 : vector<1x1x256xf32> to vector<1x256xf32>
    %65 = vector.broadcast %64 : vector<1x256xf32> to vector<8x256xf32>
    %66 = arith.mulf %62, %65 : vector<8x256xf32>
    %67 = arith.truncf %66 : vector<8x256xf32> to vector<8x256xbf16>
    %c64 = arith.constant 64 : index
    %c0_32 = arith.constant 0 : index
    %68 = vector.load %arg12[%c64, %c0_32] : memref<72x256xbf16, #tpu.memory_space<vmem>>, vector<8x256xbf16>
    tpu.vector_store %arg12[%c64, %c0_32], %67 {strides = array<i32>} : memref<72x256xbf16, #tpu.memory_space<vmem>>, vector<8x256xbf16>,
    %c0_33 = arith.constant 0 : index
    %c0_34 = arith.constant 0 : index
    %69 = vector.load %arg12[%c0_33, %c0_34] : memref<72x256xbf16, #tpu.memory_space<vmem>>, vector<72x256xbf16>
    %cst = arith.constant dense<0.000000e+00> : vector<8x256xf32>
    %70 = tpu.matmul %0, %69, %cst {dimension_numbers = #tpu.dot_dimension_numbers<[1], [0], [0], [1], [0, 0, 1, 1], [], []>} : vector<8x72xbf16>, vector<72x256xbf16>, vector<8x256xf32> -> vector<8x256xf32>
    %71 = vector.broadcast %1 : vector<8x1xf32> to vector<8x256xf32>
    %72 = arith.addf %70, %71 : vector<8x256xf32>
    %73 = vector.extract_strided_slice %72 {offsets = [0, 0], sizes = [2, 256], strides = [1, 1]} : vector<8x256xf32> to vector<2x256xf32>
    %74 = vector.extract_strided_slice %72 {offsets = [2, 0], sizes = [6, 256], strides = [1, 1]} : vector<8x256xf32> to vector<6x256xf32>
    %c255_i32_35 = arith.constant 255 : i32
    %75 = tpu.dynamic_rotate %73 by %c255_i32_35 dim 1 : vector<2x256xf32>, i32 -> vector<2x256xf32>
    %76 = arith.maximumf %73, %75 : vector<2x256xf32>
    %c254_i32 = arith.constant 254 : i32
    %77 = tpu.dynamic_rotate %76 by %c254_i32 dim 1 : vector<2x256xf32>, i32 -> vector<2x256xf32>
    %78 = arith.maximumf %76, %77 : vector<2x256xf32>
    %c252_i32 = arith.constant 252 : i32
    %79 = tpu.dynamic_rotate %78 by %c252_i32 dim 1 : vector<2x256xf32>, i32 -> vector<2x256xf32>
    %80 = arith.maximumf %78, %79 : vector<2x256xf32>
    %c240_i32_36 = arith.constant 240 : i32
    %81 = tpu.dynamic_rotate %80 by %c240_i32_36 dim 1 : vector<2x256xf32>, i32 -> vector<2x256xf32>
    %82 = arith.maximumf %80, %81 : vector<2x256xf32>
    %c224_i32 = arith.constant 224 : i32
    %83 = tpu.dynamic_rotate %82 by %c224_i32 dim 1 : vector<2x256xf32>, i32 -> vector<2x256xf32>
    %84 = arith.maximumf %82, %83 : vector<2x256xf32>
    %c192_i32 = arith.constant 192 : i32
    %85 = tpu.dynamic_rotate %84 by %c192_i32 dim 1 : vector<2x256xf32>, i32 -> vector<2x256xf32>
    %86 = arith.maximumf %84, %85 : vector<2x256xf32>
    %87 = arith.truncf %86 : vector<2x256xf32> to vector<2x256xbf16>
    %cst_37 = arith.constant dense<0.000000e+00> : vector<2x4xf32>
    %88 = tpu.matmul %87, %3, %cst_37 {dimension_numbers = #tpu.dot_dimension_numbers<[1], [0], [0], [1], [0, 0, 1, 1], [], []>} : vector<2x256xbf16>, vector<256x4xbf16>, vector<2x4xf32> -> vector<2x4xf32>
    %89 = arith.truncf %88 : vector<2x4xf32> to vector<2x4xbf16>
    %cst_38 = arith.constant 0.000000e+00 : f32
    %90 = vector.broadcast %cst_38 : f32 to vector<2x4xf32>
    %91 = vector.extract_strided_slice %4 {offsets = [0, 0, 0], sizes = [1, 4, 4], strides = [1, 1, 1]} : vector<9x4x4xbf16> to vector<1x4x4xbf16>
    %92 = vector.shape_cast %91 : vector<1x4x4xbf16> to vector<4x4xbf16>
    %cst_39 = arith.constant dense<0.000000e+00> : vector<2x4xf32>
    %93 = tpu.matmul %89, %92, %cst_39 {dimension_numbers = #tpu.dot_dimension_numbers<[1], [0], [0], [1], [0, 0, 1, 1], [], []>} : vector<2x4xbf16>, vector<4x4xbf16>, vector<2x4xf32> -> vector<2x4xf32>
    %94 = vector.extract_strided_slice %5 {offsets = [0, 0, 0], sizes = [1, 2, 1], strides = [1, 1, 1]} : vector<9x2x1xf32> to vector<1x2x1xf32>
    %95 = vector.shape_cast %94 : vector<1x2x1xf32> to vector<2x1xf32>
    %96 = vector.broadcast %95 : vector<2x1xf32> to vector<2x4xf32>
    %97 = arith.mulf %93, %96 : vector<2x4xf32>
    %98 = arith.addf %90, %97 : vector<2x4xf32>
    %99 = vector.extract_strided_slice %4 {offsets = [1, 0, 0], sizes = [1, 4, 4], strides = [1, 1, 1]} : vector<9x4x4xbf16> to vector<1x4x4xbf16>
    %100 = vector.shape_cast %99 : vector<1x4x4xbf16> to vector<4x4xbf16>
    %cst_40 = arith.constant dense<0.000000e+00> : vector<2x4xf32>
    %101 = tpu.matmul %89, %100, %cst_40 {dimension_numbers = #tpu.dot_dimension_numbers<[1], [0], [0], [1], [0, 0, 1, 1], [], []>} : vector<2x4xbf16>, vector<4x4xbf16>, vector<2x4xf32> -> vector<2x4xf32>
    %102 = vector.extract_strided_slice %5 {offsets = [1, 0, 0], sizes = [1, 2, 1], strides = [1, 1, 1]} : vector<9x2x1xf32> to vector<1x2x1xf32>
    %103 = vector.shape_cast %102 : vector<1x2x1xf32> to vector<2x1xf32>
    %104 = vector.broadcast %103 : vector<2x1xf32> to vector<2x4xf32>
    %105 = arith.mulf %101, %104 : vector<2x4xf32>
    %106 = arith.addf %98, %105 : vector<2x4xf32>
    %107 = vector.extract_strided_slice %4 {offsets = [2, 0, 0], sizes = [1, 4, 4], strides = [1, 1, 1]} : vector<9x4x4xbf16> to vector<1x4x4xbf16>
    %108 = vector.shape_cast %107 : vector<1x4x4xbf16> to vector<4x4xbf16>
    %cst_41 = arith.constant dense<0.000000e+00> : vector<2x4xf32>
    %109 = tpu.matmul %89, %108, %cst_41 {dimension_numbers = #tpu.dot_dimension_numbers<[1], [0], [0], [1], [0, 0, 1, 1], [], []>} : vector<2x4xbf16>, vector<4x4xbf16>, vector<2x4xf32> -> vector<2x4xf32>
    %110 = vector.extract_strided_slice %5 {offsets = [2, 0, 0], sizes = [1, 2, 1], strides = [1, 1, 1]} : vector<9x2x1xf32> to vector<1x2x1xf32>
    %111 = vector.shape_cast %110 : vector<1x2x1xf32> to vector<2x1xf32>
    %112 = vector.broadcast %111 : vector<2x1xf32> to vector<2x4xf32>
    %113 = arith.mulf %109, %112 : vector<2x4xf32>
    %114 = arith.addf %106, %113 : vector<2x4xf32>
    %115 = vector.extract_strided_slice %4 {offsets = [3, 0, 0], sizes = [1, 4, 4], strides = [1, 1, 1]} : vector<9x4x4xbf16> to vector<1x4x4xbf16>
    %116 = vector.shape_cast %115 : vector<1x4x4xbf16> to vector<4x4xbf16>
    %cst_42 = arith.constant dense<0.000000e+00> : vector<2x4xf32>
    %117 = tpu.matmul %89, %116, %cst_42 {dimension_numbers = #tpu.dot_dimension_numbers<[1], [0], [0], [1], [0, 0, 1, 1], [], []>} : vector<2x4xbf16>, vector<4x4xbf16>, vector<2x4xf32> -> vector<2x4xf32>
    %118 = vector.extract_strided_slice %5 {offsets = [3, 0, 0], sizes = [1, 2, 1], strides = [1, 1, 1]} : vector<9x2x1xf32> to vector<1x2x1xf32>
    %119 = vector.shape_cast %118 : vector<1x2x1xf32> to vector<2x1xf32>
    %120 = vector.broadcast %119 : vector<2x1xf32> to vector<2x4xf32>
    %121 = arith.mulf %117, %120 : vector<2x4xf32>
    %122 = arith.addf %114, %121 : vector<2x4xf32>
    %123 = vector.extract_strided_slice %4 {offsets = [4, 0, 0], sizes = [1, 4, 4], strides = [1, 1, 1]} : vector<9x4x4xbf16> to vector<1x4x4xbf16>
    %124 = vector.shape_cast %123 : vector<1x4x4xbf16> to vector<4x4xbf16>
    %cst_43 = arith.constant dense<0.000000e+00> : vector<2x4xf32>
    %125 = tpu.matmul %89, %124, %cst_43 {dimension_numbers = #tpu.dot_dimension_numbers<[1], [0], [0], [1], [0, 0, 1, 1], [], []>} : vector<2x4xbf16>, vector<4x4xbf16>, vector<2x4xf32> -> vector<2x4xf32>
    %126 = vector.extract_strided_slice %5 {offsets = [4, 0, 0], sizes = [1, 2, 1], strides = [1, 1, 1]} : vector<9x2x1xf32> to vector<1x2x1xf32>
    %127 = vector.shape_cast %126 : vector<1x2x1xf32> to vector<2x1xf32>
    %128 = vector.broadcast %127 : vector<2x1xf32> to vector<2x4xf32>
    %129 = arith.mulf %125, %128 : vector<2x4xf32>
    %130 = arith.addf %122, %129 : vector<2x4xf32>
    %131 = vector.extract_strided_slice %4 {offsets = [5, 0, 0], sizes = [1, 4, 4], strides = [1, 1, 1]} : vector<9x4x4xbf16> to vector<1x4x4xbf16>
    %132 = vector.shape_cast %131 : vector<1x4x4xbf16> to vector<4x4xbf16>
    %cst_44 = arith.constant dense<0.000000e+00> : vector<2x4xf32>
    %133 = tpu.matmul %89, %132, %cst_44 {dimension_numbers = #tpu.dot_dimension_numbers<[1], [0], [0], [1], [0, 0, 1, 1], [], []>} : vector<2x4xbf16>, vector<4x4xbf16>, vector<2x4xf32> -> vector<2x4xf32>
    %134 = vector.extract_strided_slice %5 {offsets = [5, 0, 0], sizes = [1, 2, 1], strides = [1, 1, 1]} : vector<9x2x1xf32> to vector<1x2x1xf32>
    %135 = vector.shape_cast %134 : vector<1x2x1xf32> to vector<2x1xf32>
    %136 = vector.broadcast %135 : vector<2x1xf32> to vector<2x4xf32>
    %137 = arith.mulf %133, %136 : vector<2x4xf32>
    %138 = arith.addf %130, %137 : vector<2x4xf32>
    %139 = vector.extract_strided_slice %4 {offsets = [6, 0, 0], sizes = [1, 4, 4], strides = [1, 1, 1]} : vector<9x4x4xbf16> to vector<1x4x4xbf16>
    %140 = vector.shape_cast %139 : vector<1x4x4xbf16> to vector<4x4xbf16>
    %cst_45 = arith.constant dense<0.000000e+00> : vector<2x4xf32>
    %141 = tpu.matmul %89, %140, %cst_45 {dimension_numbers = #tpu.dot_dimension_numbers<[1], [0], [0], [1], [0, 0, 1, 1], [], []>} : vector<2x4xbf16>, vector<4x4xbf16>, vector<2x4xf32> -> vector<2x4xf32>
    %142 = vector.extract_strided_slice %5 {offsets = [6, 0, 0], sizes = [1, 2, 1], strides = [1, 1, 1]} : vector<9x2x1xf32> to vector<1x2x1xf32>
    %143 = vector.shape_cast %142 : vector<1x2x1xf32> to vector<2x1xf32>
    %144 = vector.broadcast %143 : vector<2x1xf32> to vector<2x4xf32>
    %145 = arith.mulf %141, %144 : vector<2x4xf32>
    %146 = arith.addf %138, %145 : vector<2x4xf32>
    %147 = vector.extract_strided_slice %4 {offsets = [7, 0, 0], sizes = [1, 4, 4], strides = [1, 1, 1]} : vector<9x4x4xbf16> to vector<1x4x4xbf16>
    %148 = vector.shape_cast %147 : vector<1x4x4xbf16> to vector<4x4xbf16>
    %cst_46 = arith.constant dense<0.000000e+00> : vector<2x4xf32>
    %149 = tpu.matmul %89, %148, %cst_46 {dimension_numbers = #tpu.dot_dimension_numbers<[1], [0], [0], [1], [0, 0, 1, 1], [], []>} : vector<2x4xbf16>, vector<4x4xbf16>, vector<2x4xf32> -> vector<2x4xf32>
    %150 = vector.extract_strided_slice %5 {offsets = [7, 0, 0], sizes = [1, 2, 1], strides = [1, 1, 1]} : vector<9x2x1xf32> to vector<1x2x1xf32>
    %151 = vector.shape_cast %150 : vector<1x2x1xf32> to vector<2x1xf32>
    %152 = vector.broadcast %151 : vector<2x1xf32> to vector<2x4xf32>
    %153 = arith.mulf %149, %152 : vector<2x4xf32>
    %154 = arith.addf %146, %153 : vector<2x4xf32>
    %155 = vector.extract_strided_slice %4 {offsets = [8, 0, 0], sizes = [1, 4, 4], strides = [1, 1, 1]} : vector<9x4x4xbf16> to vector<1x4x4xbf16>
    %156 = vector.shape_cast %155 : vector<1x4x4xbf16> to vector<4x4xbf16>
    %cst_47 = arith.constant dense<0.000000e+00> : vector<2x4xf32>
    %157 = tpu.matmul %89, %156, %cst_47 {dimension_numbers = #tpu.dot_dimension_numbers<[1], [0], [0], [1], [0, 0, 1, 1], [], []>} : vector<2x4xbf16>, vector<4x4xbf16>, vector<2x4xf32> -> vector<2x4xf32>
    %158 = vector.extract_strided_slice %5 {offsets = [8, 0, 0], sizes = [1, 2, 1], strides = [1, 1, 1]} : vector<9x2x1xf32> to vector<1x2x1xf32>
    %159 = vector.shape_cast %158 : vector<1x2x1xf32> to vector<2x1xf32>
    %160 = vector.broadcast %159 : vector<2x1xf32> to vector<2x4xf32>
    %161 = arith.mulf %157, %160 : vector<2x4xf32>
    %162 = arith.addf %154, %161 : vector<2x4xf32>
    %163 = arith.truncf %162 : vector<2x4xf32> to vector<2x4xbf16>
    %cst_48 = arith.constant dense<0.000000e+00> : vector<2x256xf32>
    %164 = tpu.matmul %163, %6, %cst_48 {dimension_numbers = #tpu.dot_dimension_numbers<[1], [0], [0], [1], [0, 0, 1, 1], [], []>} : vector<2x4xbf16>, vector<4x256xbf16>, vector<2x256xf32> -> vector<2x256xf32>
    %cst_49 = arith.constant 5.000000e-01 : f32
    %165 = vector.broadcast %cst_49 : f32 to vector<2x256xf32>
    %166 = arith.mulf %165, %164 : vector<2x256xf32>
    %cst_50 = arith.constant 4.471500e-02 : f32
    %167 = vector.broadcast %cst_50 : f32 to vector<2x256xf32>
    %168 = arith.mulf %167, %164 : vector<2x256xf32>
    %169 = arith.mulf %168, %164 : vector<2x256xf32>
    %170 = arith.mulf %169, %164 : vector<2x256xf32>
    %171 = arith.addf %164, %170 : vector<2x256xf32>
    %cst_51 = arith.constant 0.797884583 : f32
    %172 = vector.broadcast %cst_51 : f32 to vector<2x256xf32>
    %173 = arith.mulf %172, %171 : vector<2x256xf32>
    %174 = math.tanh %173 : vector<2x256xf32>
    %cst_52 = arith.constant 1.000000e+00 : f32
    %175 = vector.broadcast %cst_52 : f32 to vector<2x256xf32>
    %176 = arith.addf %175, %174 : vector<2x256xf32>
    %177 = arith.mulf %166, %176 : vector<2x256xf32>
    %178 = arith.mulf %177, %73 : vector<2x256xf32>
    %cst_53 = arith.constant 5.000000e-01 : f32
    %179 = vector.broadcast %cst_53 : f32 to vector<6x256xf32>
    %180 = arith.mulf %179, %74 : vector<6x256xf32>
    %cst_54 = arith.constant 4.471500e-02 : f32
    %181 = vector.broadcast %cst_54 : f32 to vector<6x256xf32>
    %182 = arith.mulf %181, %74 : vector<6x256xf32>
    %183 = arith.mulf %182, %74 : vector<6x256xf32>
    %184 = arith.mulf %183, %74 : vector<6x256xf32>
    %185 = arith.addf %74, %184 : vector<6x256xf32>
    %cst_55 = arith.constant 0.797884583 : f32
    %186 = vector.broadcast %cst_55 : f32 to vector<6x256xf32>
    %187 = arith.mulf %186, %185 : vector<6x256xf32>
    %188 = math.tanh %187 : vector<6x256xf32>
    %cst_56 = arith.constant 1.000000e+00 : f32
    %189 = vector.broadcast %cst_56 : f32 to vector<6x256xf32>
    %190 = arith.addf %189, %188 : vector<6x256xf32>
    %191 = arith.mulf %180, %190 : vector<6x256xf32>
    %192 = arith.truncf %191 : vector<6x256xf32> to vector<6x256xbf16>
    %c0_57 = arith.constant 0 : index
    %c0_58 = arith.constant 0 : index
    %193 = vector.load %arg13[%c0_57, %c0_58] : memref<8x256xbf16, #tpu.memory_space<vmem>>, vector<6x256xbf16>
    tpu.vector_store %arg13[%c0_57, %c0_58], %192 {strides = array<i32>} : memref<8x256xbf16, #tpu.memory_space<vmem>>, vector<6x256xbf16>,
    %cst_59 = arith.constant 5.000000e-01 : f32
    %194 = vector.broadcast %cst_59 : f32 to vector<2x256xf32>
    %195 = arith.mulf %194, %178 : vector<2x256xf32>
    %cst_60 = arith.constant 4.471500e-02 : f32
    %196 = vector.broadcast %cst_60 : f32 to vector<2x256xf32>
    %197 = arith.mulf %196, %178 : vector<2x256xf32>
    %198 = arith.mulf %197, %178 : vector<2x256xf32>
    %199 = arith.mulf %198, %178 : vector<2x256xf32>
    %200 = arith.addf %178, %199 : vector<2x256xf32>
    %cst_61 = arith.constant 0.797884583 : f32
    %201 = vector.broadcast %cst_61 : f32 to vector<2x256xf32>
    %202 = arith.mulf %201, %200 : vector<2x256xf32>
    %203 = math.tanh %202 : vector<2x256xf32>
    %cst_62 = arith.constant 1.000000e+00 : f32
    %204 = vector.broadcast %cst_62 : f32 to vector<2x256xf32>
    %205 = arith.addf %204, %203 : vector<2x256xf32>
    %206 = arith.mulf %195, %205 : vector<2x256xf32>
    %207 = arith.truncf %206 : vector<2x256xf32> to vector<2x256xbf16>
    %c6 = arith.constant 6 : index
    %c0_63 = arith.constant 0 : index
    %208 = vector.load %arg13[%c6, %c0_63] : memref<8x256xbf16, #tpu.memory_space<vmem>>, vector<2x256xbf16>
    tpu.vector_store %arg13[%c6, %c0_63], %207 {strides = array<i32>} : memref<8x256xbf16, #tpu.memory_space<vmem>>, vector<2x256xbf16>,
    %c0_64 = arith.constant 0 : index
    %c0_65 = arith.constant 0 : index
    %209 = vector.load %arg13[%c0_64, %c0_65] : memref<8x256xbf16, #tpu.memory_space<vmem>>, vector<8x256xbf16>
    %cst_66 = arith.constant dense<0.000000e+00> : vector<8x256xf32>
    %210 = tpu.matmul %7, %209, %cst_66 {dimension_numbers = #tpu.dot_dimension_numbers<[1], [0], [0], [1], [0, 0, 1, 1], [], []>} : vector<8x8xbf16>, vector<8x256xbf16>, vector<8x256xf32> -> vector<8x256xf32>
    %211 = vector.broadcast %8 : vector<8x1xf32> to vector<8x256xf32>
    %212 = arith.addf %210, %211 : vector<8x256xf32>
    %c0_67 = arith.constant 0 : index
    %c0_68 = arith.constant 0 : index
    %c0_69 = arith.constant 0 : index
    %213 = vector.load %arg11[%c0_67, %c0_68, %c0_69] : memref<2x8x256xf32, #tpu.memory_space<vmem>>, vector<1x8x256xf32>
    %214 = vector.shape_cast %213 : vector<1x8x256xf32> to vector<8x256xf32>
    %215 = vector.shape_cast %212 : vector<8x256xf32> to vector<1x8x256xf32>
    tpu.vector_store %arg11[%c0_67, %c0_68, %c0_69], %215 {strides = array<i32>} : memref<2x8x256xf32, #tpu.memory_space<vmem>>, vector<1x8x256xf32>,
    %c1 = arith.constant 1 : index
    %c0_70 = arith.constant 0 : index
    %c0_71 = arith.constant 0 : index
    %216 = vector.load %arg1[%c1, %c0_70, %c0_71] : memref<2x8x256xf32, #tpu.memory_space<vmem>>, vector<1x8x256xf32>
    %217 = vector.shape_cast %216 : vector<1x8x256xf32> to vector<8x256xf32>
    %c17_i32_72 = arith.constant 17 : i32
    %218 = tpu.dynamic_rotate %217 by %c17_i32_72 dim 1 : vector<8x256xf32>, i32 -> vector<8x256xf32>
    %219 = vector.extract_strided_slice %2 {offsets = [0, 0, 0], sizes = [1, 1, 256], strides = [1, 1, 1]} : vector<9x1x256xf32> to vector<1x1x256xf32>
    %220 = vector.shape_cast %219 : vector<1x1x256xf32> to vector<1x256xf32>
    %221 = vector.broadcast %220 : vector<1x256xf32> to vector<8x256xf32>
    %222 = arith.mulf %218, %221 : vector<8x256xf32>
    %223 = arith.truncf %222 : vector<8x256xf32> to vector<8x256xbf16>
    %c0_73 = arith.constant 0 : index
    %c0_74 = arith.constant 0 : index
    %224 = vector.load %arg12[%c0_73, %c0_74] : memref<72x256xbf16, #tpu.memory_space<vmem>>, vector<8x256xbf16>
    tpu.vector_store %arg12[%c0_73, %c0_74], %223 {strides = array<i32>} : memref<72x256xbf16, #tpu.memory_space<vmem>>, vector<8x256xbf16>,
    %c16_i32_75 = arith.constant 16 : i32
    %225 = tpu.dynamic_rotate %217 by %c16_i32_75 dim 1 : vector<8x256xf32>, i32 -> vector<8x256xf32>
    %226 = vector.extract_strided_slice %2 {offsets = [1, 0, 0], sizes = [1, 1, 256], strides = [1, 1, 1]} : vector<9x1x256xf32> to vector<1x1x256xf32>
    %227 = vector.shape_cast %226 : vector<1x1x256xf32> to vector<1x256xf32>
    %228 = vector.broadcast %227 : vector<1x256xf32> to vector<8x256xf32>
    %229 = arith.mulf %225, %228 : vector<8x256xf32>
    %230 = arith.truncf %229 : vector<8x256xf32> to vector<8x256xbf16>
    %c8_76 = arith.constant 8 : index
    %c0_77 = arith.constant 0 : index
    %231 = vector.load %arg12[%c8_76, %c0_77] : memref<72x256xbf16, #tpu.memory_space<vmem>>, vector<8x256xbf16>
    tpu.vector_store %arg12[%c8_76, %c0_77], %230 {strides = array<i32>} : memref<72x256xbf16, #tpu.memory_space<vmem>>, vector<8x256xbf16>,
    %c15_i32_78 = arith.constant 15 : i32
    %232 = tpu.dynamic_rotate %217 by %c15_i32_78 dim 1 : vector<8x256xf32>, i32 -> vector<8x256xf32>
    %233 = vector.extract_strided_slice %2 {offsets = [2, 0, 0], sizes = [1, 1, 256], strides = [1, 1, 1]} : vector<9x1x256xf32> to vector<1x1x256xf32>
    %234 = vector.shape_cast %233 : vector<1x1x256xf32> to vector<1x256xf32>
    %235 = vector.broadcast %234 : vector<1x256xf32> to vector<8x256xf32>
    %236 = arith.mulf %232, %235 : vector<8x256xf32>
    %237 = arith.truncf %236 : vector<8x256xf32> to vector<8x256xbf16>
    %c16_79 = arith.constant 16 : index
    %c0_80 = arith.constant 0 : index
    %238 = vector.load %arg12[%c16_79, %c0_80] : memref<72x256xbf16, #tpu.memory_space<vmem>>, vector<8x256xbf16>
    tpu.vector_store %arg12[%c16_79, %c0_80], %237 {strides = array<i32>} : memref<72x256xbf16, #tpu.memory_space<vmem>>, vector<8x256xbf16>,
    %c1_i32_81 = arith.constant 1 : i32
    %239 = tpu.dynamic_rotate %217 by %c1_i32_81 dim 1 : vector<8x256xf32>, i32 -> vector<8x256xf32>
    %240 = vector.extract_strided_slice %2 {offsets = [3, 0, 0], sizes = [1, 1, 256], strides = [1, 1, 1]} : vector<9x1x256xf32> to vector<1x1x256xf32>
    %241 = vector.shape_cast %240 : vector<1x1x256xf32> to vector<1x256xf32>
    %242 = vector.broadcast %241 : vector<1x256xf32> to vector<8x256xf32>
    %243 = arith.mulf %239, %242 : vector<8x256xf32>
    %244 = arith.truncf %243 : vector<8x256xf32> to vector<8x256xbf16>
    %c24_82 = arith.constant 24 : index
    %c0_83 = arith.constant 0 : index
    %245 = vector.load %arg12[%c24_82, %c0_83] : memref<72x256xbf16, #tpu.memory_space<vmem>>, vector<8x256xbf16>
    tpu.vector_store %arg12[%c24_82, %c0_83], %244 {strides = array<i32>} : memref<72x256xbf16, #tpu.memory_space<vmem>>, vector<8x256xbf16>,
    %246 = arith.truncf %217 : vector<8x256xf32> to vector<8x256xbf16>
    %c32_84 = arith.constant 32 : index
    %c0_85 = arith.constant 0 : index
    %247 = vector.load %arg12[%c32_84, %c0_85] : memref<72x256xbf16, #tpu.memory_space<vmem>>, vector<8x256xbf16>
    tpu.vector_store %arg12[%c32_84, %c0_85], %246 {strides = array<i32>} : memref<72x256xbf16, #tpu.memory_space<vmem>>, vector<8x256xbf16>,
    %c255_i32_86 = arith.constant 255 : i32
    %248 = tpu.dynamic_rotate %217 by %c255_i32_86 dim 1 : vector<8x256xf32>, i32 -> vector<8x256xf32>
    %249 = vector.extract_strided_slice %2 {offsets = [5, 0, 0], sizes = [1, 1, 256], strides = [1, 1, 1]} : vector<9x1x256xf32> to vector<1x1x256xf32>
    %250 = vector.shape_cast %249 : vector<1x1x256xf32> to vector<1x256xf32>
    %251 = vector.broadcast %250 : vector<1x256xf32> to vector<8x256xf32>
    %252 = arith.mulf %248, %251 : vector<8x256xf32>
    %253 = arith.truncf %252 : vector<8x256xf32> to vector<8x256xbf16>
    %c40_87 = arith.constant 40 : index
    %c0_88 = arith.constant 0 : index
    %254 = vector.load %arg12[%c40_87, %c0_88] : memref<72x256xbf16, #tpu.memory_space<vmem>>, vector<8x256xbf16>
    tpu.vector_store %arg12[%c40_87, %c0_88], %253 {strides = array<i32>} : memref<72x256xbf16, #tpu.memory_space<vmem>>, vector<8x256xbf16>,
    %c241_i32_89 = arith.constant 241 : i32
    %255 = tpu.dynamic_rotate %217 by %c241_i32_89 dim 1 : vector<8x256xf32>, i32 -> vector<8x256xf32>
    %256 = vector.extract_strided_slice %2 {offsets = [6, 0, 0], sizes = [1, 1, 256], strides = [1, 1, 1]} : vector<9x1x256xf32> to vector<1x1x256xf32>
    %257 = vector.shape_cast %256 : vector<1x1x256xf32> to vector<1x256xf32>
    %258 = vector.broadcast %257 : vector<1x256xf32> to vector<8x256xf32>
    %259 = arith.mulf %255, %258 : vector<8x256xf32>
    %260 = arith.truncf %259 : vector<8x256xf32> to vector<8x256xbf16>
    %c48_90 = arith.constant 48 : index
    %c0_91 = arith.constant 0 : index
    %261 = vector.load %arg12[%c48_90, %c0_91] : memref<72x256xbf16, #tpu.memory_space<vmem>>, vector<8x256xbf16>
    tpu.vector_store %arg12[%c48_90, %c0_91], %260 {strides = array<i32>} : memref<72x256xbf16, #tpu.memory_space<vmem>>, vector<8x256xbf16>,
    %c240_i32_92 = arith.constant 240 : i32
    %262 = tpu.dynamic_rotate %217 by %c240_i32_92 dim 1 : vector<8x256xf32>, i32 -> vector<8x256xf32>
    %263 = vector.extract_strided_slice %2 {offsets = [7, 0, 0], sizes = [1, 1, 256], strides = [1, 1, 1]} : vector<9x1x256xf32> to vector<1x1x256xf32>
    %264 = vector.shape_cast %263 : vector<1x1x256xf32> to vector<1x256xf32>
    %265 = vector.broadcast %264 : vector<1x256xf32> to vector<8x256xf32>
    %266 = arith.mulf %262, %265 : vector<8x256xf32>
    %267 = arith.truncf %266 : vector<8x256xf32> to vector<8x256xbf16>
    %c56_93 = arith.constant 56 : index
    %c0_94 = arith.constant 0 : index
    %268 = vector.load %arg12[%c56_93, %c0_94] : memref<72x256xbf16, #tpu.memory_space<vmem>>, vector<8x256xbf16>
    tpu.vector_store %arg12[%c56_93, %c0_94], %267 {strides = array<i32>} : memref<72x256xbf16, #tpu.memory_space<vmem>>, vector<8x256xbf16>,
    %c239_i32_95 = arith.constant 239 : i32
    %269 = tpu.dynamic_rotate %217 by %c239_i32_95 dim 1 : vector<8x256xf32>, i32 -> vector<8x256xf32>
    %270 = vector.extract_strided_slice %2 {offsets = [8, 0, 0], sizes = [1, 1, 256], strides = [1, 1, 1]} : vector<9x1x256xf32> to vector<1x1x256xf32>
    %271 = vector.shape_cast %270 : vector<1x1x256xf32> to vector<1x256xf32>
    %272 = vector.broadcast %271 : vector<1x256xf32> to vector<8x256xf32>
    %273 = arith.mulf %269, %272 : vector<8x256xf32>
    %274 = arith.truncf %273 : vector<8x256xf32> to vector<8x256xbf16>
    %c64_96 = arith.constant 64 : index
    %c0_97 = arith.constant 0 : index
    %275 = vector.load %arg12[%c64_96, %c0_97] : memref<72x256xbf16, #tpu.memory_space<vmem>>, vector<8x256xbf16>
    tpu.vector_store %arg12[%c64_96, %c0_97], %274 {strides = array<i32>} : memref<72x256xbf16, #tpu.memory_space<vmem>>, vector<8x256xbf16>,
    %c0_98 = arith.constant 0 : index
    %c0_99 = arith.constant 0 : index
    %276 = vector.load %arg12[%c0_98, %c0_99] : memref<72x256xbf16, #tpu.memory_space<vmem>>, vector<72x256xbf16>
    %cst_100 = arith.constant dense<0.000000e+00> : vector<8x256xf32>
    %277 = tpu.matmul %0, %276, %cst_100 {dimension_numbers = #tpu.dot_dimension_numbers<[1], [0], [0], [1], [0, 0, 1, 1], [], []>} : vector<8x72xbf16>, vector<72x256xbf16>, vector<8x256xf32> -> vector<8x256xf32>
    %278 = vector.broadcast %1 : vector<8x1xf32> to vector<8x256xf32>
    %279 = arith.addf %277, %278 : vector<8x256xf32>
    %280 = vector.extract_strided_slice %279 {offsets = [0, 0], sizes = [2, 256], strides = [1, 1]} : vector<8x256xf32> to vector<2x256xf32>
    %281 = vector.extract_strided_slice %279 {offsets = [2, 0], sizes = [6, 256], strides = [1, 1]} : vector<8x256xf32> to vector<6x256xf32>
    %c255_i32_101 = arith.constant 255 : i32
    %282 = tpu.dynamic_rotate %280 by %c255_i32_101 dim 1 : vector<2x256xf32>, i32 -> vector<2x256xf32>
    %283 = arith.maximumf %280, %282 : vector<2x256xf32>
    %c254_i32_102 = arith.constant 254 : i32
    %284 = tpu.dynamic_rotate %283 by %c254_i32_102 dim 1 : vector<2x256xf32>, i32 -> vector<2x256xf32>
    %285 = arith.maximumf %283, %284 : vector<2x256xf32>
    %c252_i32_103 = arith.constant 252 : i32
    %286 = tpu.dynamic_rotate %285 by %c252_i32_103 dim 1 : vector<2x256xf32>, i32 -> vector<2x256xf32>
    %287 = arith.maximumf %285, %286 : vector<2x256xf32>
    %c240_i32_104 = arith.constant 240 : i32
    %288 = tpu.dynamic_rotate %287 by %c240_i32_104 dim 1 : vector<2x256xf32>, i32 -> vector<2x256xf32>
    %289 = arith.maximumf %287, %288 : vector<2x256xf32>
    %c224_i32_105 = arith.constant 224 : i32
    %290 = tpu.dynamic_rotate %289 by %c224_i32_105 dim 1 : vector<2x256xf32>, i32 -> vector<2x256xf32>
    %291 = arith.maximumf %289, %290 : vector<2x256xf32>
    %c192_i32_106 = arith.constant 192 : i32
    %292 = tpu.dynamic_rotate %291 by %c192_i32_106 dim 1 : vector<2x256xf32>, i32 -> vector<2x256xf32>
    %293 = arith.maximumf %291, %292 : vector<2x256xf32>
    %294 = arith.truncf %293 : vector<2x256xf32> to vector<2x256xbf16>
    %cst_107 = arith.constant dense<0.000000e+00> : vector<2x4xf32>
    %295 = tpu.matmul %294, %3, %cst_107 {dimension_numbers = #tpu.dot_dimension_numbers<[1], [0], [0], [1], [0, 0, 1, 1], [], []>} : vector<2x256xbf16>, vector<256x4xbf16>, vector<2x4xf32> -> vector<2x4xf32>
    %296 = arith.truncf %295 : vector<2x4xf32> to vector<2x4xbf16>
    %cst_108 = arith.constant 0.000000e+00 : f32
    %297 = vector.broadcast %cst_108 : f32 to vector<2x4xf32>
    %298 = vector.extract_strided_slice %4 {offsets = [0, 0, 0], sizes = [1, 4, 4], strides = [1, 1, 1]} : vector<9x4x4xbf16> to vector<1x4x4xbf16>
    %299 = vector.shape_cast %298 : vector<1x4x4xbf16> to vector<4x4xbf16>
    %cst_109 = arith.constant dense<0.000000e+00> : vector<2x4xf32>
    %300 = tpu.matmul %296, %299, %cst_109 {dimension_numbers = #tpu.dot_dimension_numbers<[1], [0], [0], [1], [0, 0, 1, 1], [], []>} : vector<2x4xbf16>, vector<4x4xbf16>, vector<2x4xf32> -> vector<2x4xf32>
    %301 = vector.extract_strided_slice %5 {offsets = [0, 0, 0], sizes = [1, 2, 1], strides = [1, 1, 1]} : vector<9x2x1xf32> to vector<1x2x1xf32>
    %302 = vector.shape_cast %301 : vector<1x2x1xf32> to vector<2x1xf32>
    %303 = vector.broadcast %302 : vector<2x1xf32> to vector<2x4xf32>
    %304 = arith.mulf %300, %303 : vector<2x4xf32>
    %305 = arith.addf %297, %304 : vector<2x4xf32>
    %306 = vector.extract_strided_slice %4 {offsets = [1, 0, 0], sizes = [1, 4, 4], strides = [1, 1, 1]} : vector<9x4x4xbf16> to vector<1x4x4xbf16>
    %307 = vector.shape_cast %306 : vector<1x4x4xbf16> to vector<4x4xbf16>
    %cst_110 = arith.constant dense<0.000000e+00> : vector<2x4xf32>
    %308 = tpu.matmul %296, %307, %cst_110 {dimension_numbers = #tpu.dot_dimension_numbers<[1], [0], [0], [1], [0, 0, 1, 1], [], []>} : vector<2x4xbf16>, vector<4x4xbf16>, vector<2x4xf32> -> vector<2x4xf32>
    %309 = vector.extract_strided_slice %5 {offsets = [1, 0, 0], sizes = [1, 2, 1], strides = [1, 1, 1]} : vector<9x2x1xf32> to vector<1x2x1xf32>
    %310 = vector.shape_cast %309 : vector<1x2x1xf32> to vector<2x1xf32>
    %311 = vector.broadcast %310 : vector<2x1xf32> to vector<2x4xf32>
    %312 = arith.mulf %308, %311 : vector<2x4xf32>
    %313 = arith.addf %305, %312 : vector<2x4xf32>
    %314 = vector.extract_strided_slice %4 {offsets = [2, 0, 0], sizes = [1, 4, 4], strides = [1, 1, 1]} : vector<9x4x4xbf16> to vector<1x4x4xbf16>
    %315 = vector.shape_cast %314 : vector<1x4x4xbf16> to vector<4x4xbf16>
    %cst_111 = arith.constant dense<0.000000e+00> : vector<2x4xf32>
    %316 = tpu.matmul %296, %315, %cst_111 {dimension_numbers = #tpu.dot_dimension_numbers<[1], [0], [0], [1], [0, 0, 1, 1], [], []>} : vector<2x4xbf16>, vector<4x4xbf16>, vector<2x4xf32> -> vector<2x4xf32>
    %317 = vector.extract_strided_slice %5 {offsets = [2, 0, 0], sizes = [1, 2, 1], strides = [1, 1, 1]} : vector<9x2x1xf32> to vector<1x2x1xf32>
    %318 = vector.shape_cast %317 : vector<1x2x1xf32> to vector<2x1xf32>
    %319 = vector.broadcast %318 : vector<2x1xf32> to vector<2x4xf32>
    %320 = arith.mulf %316, %319 : vector<2x4xf32>
    %321 = arith.addf %313, %320 : vector<2x4xf32>
    %322 = vector.extract_strided_slice %4 {offsets = [3, 0, 0], sizes = [1, 4, 4], strides = [1, 1, 1]} : vector<9x4x4xbf16> to vector<1x4x4xbf16>
    %323 = vector.shape_cast %322 : vector<1x4x4xbf16> to vector<4x4xbf16>
    %cst_112 = arith.constant dense<0.000000e+00> : vector<2x4xf32>
    %324 = tpu.matmul %296, %323, %cst_112 {dimension_numbers = #tpu.dot_dimension_numbers<[1], [0], [0], [1], [0, 0, 1, 1], [], []>} : vector<2x4xbf16>, vector<4x4xbf16>, vector<2x4xf32> -> vector<2x4xf32>
    %325 = vector.extract_strided_slice %5 {offsets = [3, 0, 0], sizes = [1, 2, 1], strides = [1, 1, 1]} : vector<9x2x1xf32> to vector<1x2x1xf32>
    %326 = vector.shape_cast %325 : vector<1x2x1xf32> to vector<2x1xf32>
    %327 = vector.broadcast %326 : vector<2x1xf32> to vector<2x4xf32>
    %328 = arith.mulf %324, %327 : vector<2x4xf32>
    %329 = arith.addf %321, %328 : vector<2x4xf32>
    %330 = vector.extract_strided_slice %4 {offsets = [4, 0, 0], sizes = [1, 4, 4], strides = [1, 1, 1]} : vector<9x4x4xbf16> to vector<1x4x4xbf16>
    %331 = vector.shape_cast %330 : vector<1x4x4xbf16> to vector<4x4xbf16>
    %cst_113 = arith.constant dense<0.000000e+00> : vector<2x4xf32>
    %332 = tpu.matmul %296, %331, %cst_113 {dimension_numbers = #tpu.dot_dimension_numbers<[1], [0], [0], [1], [0, 0, 1, 1], [], []>} : vector<2x4xbf16>, vector<4x4xbf16>, vector<2x4xf32> -> vector<2x4xf32>
    %333 = vector.extract_strided_slice %5 {offsets = [4, 0, 0], sizes = [1, 2, 1], strides = [1, 1, 1]} : vector<9x2x1xf32> to vector<1x2x1xf32>
    %334 = vector.shape_cast %333 : vector<1x2x1xf32> to vector<2x1xf32>
    %335 = vector.broadcast %334 : vector<2x1xf32> to vector<2x4xf32>
    %336 = arith.mulf %332, %335 : vector<2x4xf32>
    %337 = arith.addf %329, %336 : vector<2x4xf32>
    %338 = vector.extract_strided_slice %4 {offsets = [5, 0, 0], sizes = [1, 4, 4], strides = [1, 1, 1]} : vector<9x4x4xbf16> to vector<1x4x4xbf16>
    %339 = vector.shape_cast %338 : vector<1x4x4xbf16> to vector<4x4xbf16>
    %cst_114 = arith.constant dense<0.000000e+00> : vector<2x4xf32>
    %340 = tpu.matmul %296, %339, %cst_114 {dimension_numbers = #tpu.dot_dimension_numbers<[1], [0], [0], [1], [0, 0, 1, 1], [], []>} : vector<2x4xbf16>, vector<4x4xbf16>, vector<2x4xf32> -> vector<2x4xf32>
    %341 = vector.extract_strided_slice %5 {offsets = [5, 0, 0], sizes = [1, 2, 1], strides = [1, 1, 1]} : vector<9x2x1xf32> to vector<1x2x1xf32>
    %342 = vector.shape_cast %341 : vector<1x2x1xf32> to vector<2x1xf32>
    %343 = vector.broadcast %342 : vector<2x1xf32> to vector<2x4xf32>
    %344 = arith.mulf %340, %343 : vector<2x4xf32>
    %345 = arith.addf %337, %344 : vector<2x4xf32>
    %346 = vector.extract_strided_slice %4 {offsets = [6, 0, 0], sizes = [1, 4, 4], strides = [1, 1, 1]} : vector<9x4x4xbf16> to vector<1x4x4xbf16>
    %347 = vector.shape_cast %346 : vector<1x4x4xbf16> to vector<4x4xbf16>
    %cst_115 = arith.constant dense<0.000000e+00> : vector<2x4xf32>
    %348 = tpu.matmul %296, %347, %cst_115 {dimension_numbers = #tpu.dot_dimension_numbers<[1], [0], [0], [1], [0, 0, 1, 1], [], []>} : vector<2x4xbf16>, vector<4x4xbf16>, vector<2x4xf32> -> vector<2x4xf32>
    %349 = vector.extract_strided_slice %5 {offsets = [6, 0, 0], sizes = [1, 2, 1], strides = [1, 1, 1]} : vector<9x2x1xf32> to vector<1x2x1xf32>
    %350 = vector.shape_cast %349 : vector<1x2x1xf32> to vector<2x1xf32>
    %351 = vector.broadcast %350 : vector<2x1xf32> to vector<2x4xf32>
    %352 = arith.mulf %348, %351 : vector<2x4xf32>
    %353 = arith.addf %345, %352 : vector<2x4xf32>
    %354 = vector.extract_strided_slice %4 {offsets = [7, 0, 0], sizes = [1, 4, 4], strides = [1, 1, 1]} : vector<9x4x4xbf16> to vector<1x4x4xbf16>
    %355 = vector.shape_cast %354 : vector<1x4x4xbf16> to vector<4x4xbf16>
    %cst_116 = arith.constant dense<0.000000e+00> : vector<2x4xf32>
    %356 = tpu.matmul %296, %355, %cst_116 {dimension_numbers = #tpu.dot_dimension_numbers<[1], [0], [0], [1], [0, 0, 1, 1], [], []>} : vector<2x4xbf16>, vector<4x4xbf16>, vector<2x4xf32> -> vector<2x4xf32>
    %357 = vector.extract_strided_slice %5 {offsets = [7, 0, 0], sizes = [1, 2, 1], strides = [1, 1, 1]} : vector<9x2x1xf32> to vector<1x2x1xf32>
    %358 = vector.shape_cast %357 : vector<1x2x1xf32> to vector<2x1xf32>
    %359 = vector.broadcast %358 : vector<2x1xf32> to vector<2x4xf32>
    %360 = arith.mulf %356, %359 : vector<2x4xf32>
    %361 = arith.addf %353, %360 : vector<2x4xf32>
    %362 = vector.extract_strided_slice %4 {offsets = [8, 0, 0], sizes = [1, 4, 4], strides = [1, 1, 1]} : vector<9x4x4xbf16> to vector<1x4x4xbf16>
    %363 = vector.shape_cast %362 : vector<1x4x4xbf16> to vector<4x4xbf16>
    %cst_117 = arith.constant dense<0.000000e+00> : vector<2x4xf32>
    %364 = tpu.matmul %296, %363, %cst_117 {dimension_numbers = #tpu.dot_dimension_numbers<[1], [0], [0], [1], [0, 0, 1, 1], [], []>} : vector<2x4xbf16>, vector<4x4xbf16>, vector<2x4xf32> -> vector<2x4xf32>
    %365 = vector.extract_strided_slice %5 {offsets = [8, 0, 0], sizes = [1, 2, 1], strides = [1, 1, 1]} : vector<9x2x1xf32> to vector<1x2x1xf32>
    %366 = vector.shape_cast %365 : vector<1x2x1xf32> to vector<2x1xf32>
    %367 = vector.broadcast %366 : vector<2x1xf32> to vector<2x4xf32>
    %368 = arith.mulf %364, %367 : vector<2x4xf32>
    %369 = arith.addf %361, %368 : vector<2x4xf32>
    %370 = arith.truncf %369 : vector<2x4xf32> to vector<2x4xbf16>
    %cst_118 = arith.constant dense<0.000000e+00> : vector<2x256xf32>
    %371 = tpu.matmul %370, %6, %cst_118 {dimension_numbers = #tpu.dot_dimension_numbers<[1], [0], [0], [1], [0, 0, 1, 1], [], []>} : vector<2x4xbf16>, vector<4x256xbf16>, vector<2x256xf32> -> vector<2x256xf32>
    %cst_119 = arith.constant 5.000000e-01 : f32
    %372 = vector.broadcast %cst_119 : f32 to vector<2x256xf32>
    %373 = arith.mulf %372, %371 : vector<2x256xf32>
    %cst_120 = arith.constant 4.471500e-02 : f32
    %374 = vector.broadcast %cst_120 : f32 to vector<2x256xf32>
    %375 = arith.mulf %374, %371 : vector<2x256xf32>
    %376 = arith.mulf %375, %371 : vector<2x256xf32>
    %377 = arith.mulf %376, %371 : vector<2x256xf32>
    %378 = arith.addf %371, %377 : vector<2x256xf32>
    %cst_121 = arith.constant 0.797884583 : f32
    %379 = vector.broadcast %cst_121 : f32 to vector<2x256xf32>
    %380 = arith.mulf %379, %378 : vector<2x256xf32>
    %381 = math.tanh %380 : vector<2x256xf32>
    %cst_122 = arith.constant 1.000000e+00 : f32
    %382 = vector.broadcast %cst_122 : f32 to vector<2x256xf32>
    %383 = arith.addf %382, %381 : vector<2x256xf32>
    %384 = arith.mulf %373, %383 : vector<2x256xf32>
    %385 = arith.mulf %384, %280 : vector<2x256xf32>
    %cst_123 = arith.constant 5.000000e-01 : f32
    %386 = vector.broadcast %cst_123 : f32 to vector<6x256xf32>
    %387 = arith.mulf %386, %281 : vector<6x256xf32>
    %cst_124 = arith.constant 4.471500e-02 : f32
    %388 = vector.broadcast %cst_124 : f32 to vector<6x256xf32>
    %389 = arith.mulf %388, %281 : vector<6x256xf32>
    %390 = arith.mulf %389, %281 : vector<6x256xf32>
    %391 = arith.mulf %390, %281 : vector<6x256xf32>
    %392 = arith.addf %281, %391 : vector<6x256xf32>
    %cst_125 = arith.constant 0.797884583 : f32
    %393 = vector.broadcast %cst_125 : f32 to vector<6x256xf32>
    %394 = arith.mulf %393, %392 : vector<6x256xf32>
    %395 = math.tanh %394 : vector<6x256xf32>
    %cst_126 = arith.constant 1.000000e+00 : f32
    %396 = vector.broadcast %cst_126 : f32 to vector<6x256xf32>
    %397 = arith.addf %396, %395 : vector<6x256xf32>
    %398 = arith.mulf %387, %397 : vector<6x256xf32>
    %399 = arith.truncf %398 : vector<6x256xf32> to vector<6x256xbf16>
    %c0_127 = arith.constant 0 : index
    %c0_128 = arith.constant 0 : index
    %400 = vector.load %arg13[%c0_127, %c0_128] : memref<8x256xbf16, #tpu.memory_space<vmem>>, vector<6x256xbf16>
    tpu.vector_store %arg13[%c0_127, %c0_128], %399 {strides = array<i32>} : memref<8x256xbf16, #tpu.memory_space<vmem>>, vector<6x256xbf16>,
    %cst_129 = arith.constant 5.000000e-01 : f32
    %401 = vector.broadcast %cst_129 : f32 to vector<2x256xf32>
    %402 = arith.mulf %401, %385 : vector<2x256xf32>
    %cst_130 = arith.constant 4.471500e-02 : f32
    %403 = vector.broadcast %cst_130 : f32 to vector<2x256xf32>
    %404 = arith.mulf %403, %385 : vector<2x256xf32>
    %405 = arith.mulf %404, %385 : vector<2x256xf32>
    %406 = arith.mulf %405, %385 : vector<2x256xf32>
    %407 = arith.addf %385, %406 : vector<2x256xf32>
    %cst_131 = arith.constant 0.797884583 : f32
    %408 = vector.broadcast %cst_131 : f32 to vector<2x256xf32>
    %409 = arith.mulf %408, %407 : vector<2x256xf32>
    %410 = math.tanh %409 : vector<2x256xf32>
    %cst_132 = arith.constant 1.000000e+00 : f32
    %411 = vector.broadcast %cst_132 : f32 to vector<2x256xf32>
    %412 = arith.addf %411, %410 : vector<2x256xf32>
    %413 = arith.mulf %402, %412 : vector<2x256xf32>
    %414 = arith.truncf %413 : vector<2x256xf32> to vector<2x256xbf16>
    %c6_133 = arith.constant 6 : index
    %c0_134 = arith.constant 0 : index
    %415 = vector.load %arg13[%c6_133, %c0_134] : memref<8x256xbf16, #tpu.memory_space<vmem>>, vector<2x256xbf16>
    tpu.vector_store %arg13[%c6_133, %c0_134], %414 {strides = array<i32>} : memref<8x256xbf16, #tpu.memory_space<vmem>>, vector<2x256xbf16>,
    %c0_135 = arith.constant 0 : index
    %c0_136 = arith.constant 0 : index
    %416 = vector.load %arg13[%c0_135, %c0_136] : memref<8x256xbf16, #tpu.memory_space<vmem>>, vector<8x256xbf16>
    %cst_137 = arith.constant dense<0.000000e+00> : vector<8x256xf32>
    %417 = tpu.matmul %7, %416, %cst_137 {dimension_numbers = #tpu.dot_dimension_numbers<[1], [0], [0], [1], [0, 0, 1, 1], [], []>} : vector<8x8xbf16>, vector<8x256xbf16>, vector<8x256xf32> -> vector<8x256xf32>
    %418 = vector.broadcast %8 : vector<8x1xf32> to vector<8x256xf32>
    %419 = arith.addf %417, %418 : vector<8x256xf32>
    %c1_138 = arith.constant 1 : index
    %c0_139 = arith.constant 0 : index
    %c0_140 = arith.constant 0 : index
    %420 = vector.load %arg11[%c1_138, %c0_139, %c0_140] : memref<2x8x256xf32, #tpu.memory_space<vmem>>, vector<1x8x256xf32>
    %421 = vector.shape_cast %420 : vector<1x8x256xf32> to vector<8x256xf32>
    %422 = vector.shape_cast %419 : vector<8x256xf32> to vector<1x8x256xf32>
    tpu.vector_store %arg11[%c1_138, %c0_139, %c0_140], %422 {strides = array<i32>} : memref<2x8x256xf32, #tpu.memory_space<vmem>>, vector<1x8x256xf32>,
    return
  }
  func.func @transform_0(%arg0: i32) -> (i32, i32, i32) {
    %c0_i32 = arith.constant 0 : i32
    %c0_i32_0 = arith.constant 0 : i32
    %c0_i32_1 = arith.constant 0 : i32
    return %arg0, %c0_i32, %c0_i32_0 : i32, i32, i32
  }
  func.func @transform_1(%arg0: i32) -> (i32, i32) {
    %c0_i32 = arith.constant 0 : i32
    %c0_i32_0 = arith.constant 0 : i32
    %c0_i32_1 = arith.constant 0 : i32
    return %c0_i32, %c0_i32_0 : i32, i32
  }
  func.func @transform_2(%arg0: i32) -> (i32, i32) {
    %c0_i32 = arith.constant 0 : i32
    %c0_i32_0 = arith.constant 0 : i32
    %c0_i32_1 = arith.constant 0 : i32
    return %c0_i32, %c0_i32_0 : i32, i32
  }
  func.func @transform_3(%arg0: i32) -> (i32, i32, i32) {
    %c0_i32 = arith.constant 0 : i32
    %c0_i32_0 = arith.constant 0 : i32
    %c0_i32_1 = arith.constant 0 : i32
    %c0_i32_2 = arith.constant 0 : i32
    return %c0_i32, %c0_i32_0, %c0_i32_1 : i32, i32, i32
  }
  func.func @transform_4(%arg0: i32) -> (i32, i32) {
    %c0_i32 = arith.constant 0 : i32
    %c0_i32_0 = arith.constant 0 : i32
    %c0_i32_1 = arith.constant 0 : i32
    return %c0_i32, %c0_i32_0 : i32, i32
  }
  func.func @transform_5(%arg0: i32) -> (i32, i32, i32) {
    %c0_i32 = arith.constant 0 : i32
    %c0_i32_0 = arith.constant 0 : i32
    %c0_i32_1 = arith.constant 0 : i32
    %c0_i32_2 = arith.constant 0 : i32
    return %c0_i32, %c0_i32_0, %c0_i32_1 : i32, i32, i32
  }
  func.func @transform_6(%arg0: i32) -> (i32, i32, i32) {
    %c0_i32 = arith.constant 0 : i32
    %c0_i32_0 = arith.constant 0 : i32
    %c0_i32_1 = arith.constant 0 : i32
    %c0_i32_2 = arith.constant 0 : i32
    return %c0_i32, %c0_i32_0, %c0_i32_1 : i32, i32, i32
  }
  func.func @transform_7(%arg0: i32) -> (i32, i32) {
    %c0_i32 = arith.constant 0 : i32
    %c0_i32_0 = arith.constant 0 : i32
    %c0_i32_1 = arith.constant 0 : i32
    return %c0_i32, %c0_i32_0 : i32, i32
  }
  func.func @transform_8(%arg0: i32) -> (i32, i32) {
    %c0_i32 = arith.constant 0 : i32
    %c0_i32_0 = arith.constant 0 : i32
    %c0_i32_1 = arith.constant 0 : i32
    return %c0_i32, %c0_i32_0 : i32, i32
  }
  func.func @transform_9(%arg0: i32) -> (i32, i32) {
    %c0_i32 = arith.constant 0 : i32
    %c0_i32_0 = arith.constant 0 : i32
    %c0_i32_1 = arith.constant 0 : i32
    return %c0_i32, %c0_i32_0 : i32, i32
  }
  func.func @transform_10(%arg0: i32) -> (i32, i32, i32) {
    %c0_i32 = arith.constant 0 : i32
    %c0_i32_0 = arith.constant 0 : i32
    %c0_i32_1 = arith.constant 0 : i32
    return %arg0, %c0_i32, %c0_i32_0 : i32, i32, i32
  }
}

</mosaic_0001>

<bundles_post_ra>
// kernel: tpu_custom_call.1
= control target key start
LH: loop header
LB: loop body
LE: loop exit
PB: predicated region body
PF: predicated region fallthrough
CT: control target
= control target key end

     0   :  { %s2516_s0 = inlined_call_operand.vmem [shape: f32[2,8,256], index: 0, kind: input, shape index: {}]   ;;  %s2517_s1 = inlined_call_operand.vmem [shape: bf16[8,72], index: 1, kind: input, shape index: {}]   ;;  %s2518_s2 = inlined_call_operand.vmem [shape: f32[8,1], index: 2, kind: input, shape index: {}]   ;;  %s2519_s3 = inlined_call_operand.vmem [shape: f32[9,1,256], index: 3, kind: input, shape index: {}]   ;;  %s2520_s4 = inlined_call_operand.vmem [shape: bf16[256,4], index: 4, kind: input, shape index: {}]   ;;  %s2521_s5 = inlined_call_operand.vmem [shape: bf16[9,4,4], index: 5, kind: input, shape index: {}]   ;;  %s2522_s6 = inlined_call_operand.vmem [shape: f32[9,2,1], index: 6, kind: input, shape index: {}]   ;;  %s2523_s7 = inlined_call_operand.vmem [shape: bf16[4,256], index: 7, kind: input, shape index: {}]   ;;  %s2524_s8 = inlined_call_operand.vmem [shape: bf16[8,8], index: 8, kind: input, shape index: {}]   ;;  %s2525_s9 = inlined_call_operand.vmem [shape: f32[8,1], index: 9, kind: input, shape index: {}]   ;;  %s2526_s10 = inlined_call_operand.hbm [shape: f32[2,8,256], index: 10, kind: output, shape index: {}]  }
   0x1   :  { %v100_v0 = vld [vmem:[%s2516_s0] sm:$0xff] }
   0x2   :  { %15 = vsyncpa [#allocation5], 0  ;;  %s1744_s15 = smov 113   ;;  %s1745_s16 = smov 111   ;;  %v101_v1 = vld [vmem:[%s2516_s0 + $0x8] sm:$0xff]  ;;  %v106_v2 = vlaneseq  ;;  %v1873_v23 = vld [vmem:[%s2516_s0 + $0x10] sm:$0xff] }
   0x3   :  { %186 = vrot.lane.b32.xlu1 %v100_v0, %s1744_s15  ;;  %218 = vrot.lane.b32.xlu0 %v100_v0, %s1745_s16  ;;  %s1746_s17 = smov 112   ;;  %s1747_s20 = smov 127   ;;  %v1841_v5 = vld [vmem:[%s2519_s3 + $0xe] sm:$0x3]  ;;  %v168_v14 = vpack.c.bf16 %v101_v1, %v100_v0  ;;  %v1857_v17 = vld [vmem:[%s2519_s3 + $0xc] sm:$0x3] }
   0x4   :  { %202 = vrot.lane.b32.xlu2 %v100_v0, %s1746_s17  ;;  %s1748_s21 = smov 15   ;;  %s1749_s22 = smov 1   ;;  %v1836_v4 = vand.u32 127, %v106_v2  ;;  %v210_v6 = vperm.slane %v1841_v5, 0  ;;  %v211_v7 = vperm.slane %v1841_v5, 1  ;;  %v194_v19 = vperm.slane %v1857_v17, 0 }
   0x5   :  { %s1750_s23 = smov 17   ;;  %s1751_s24 = smov 16   ;;  %169 = vst [vmem:[#allocation2 + $0x20] sm:$0xff] %v168_v14  ;;  %v1862_v18 = vld [vmem:[%s2519_s3 + $0x10] sm:$0x3]  ;;  %v195_v20 = vperm.slane %v1857_v17, 1 }
   0x6   :  { %vm206_vm0 = vcmp.lt.s32.totalorder %v1836_v4, 112  ;;  %vm190_vm1 = vcmp.lt.s32.totalorder %v1836_v4, 113  ;;  %vm222_vm2 = vcmp.lt.s32.totalorder %v1836_v4, 111  ;;  %v226_v21 = vperm.slane %v1862_v18, 0  ;;  %v1878_v24 = vld [vmem:[%s2516_s0 + $0x18] sm:$0xff]  ;;  %s1754_s14 = smov 124  }
   0x7   :  { %v227_v22 = vperm.slane %v1862_v18, 1  ;;  %v916_v25 = vpack.c.bf16 %v1878_v24, %v1873_v23  ;;  %v1905_v38 = vld [vmem:[%s2519_s3 + $0xa] sm:$0x3]  ;;  %vm174_vm3 = vcmp.lt.s32.totalorder %v1836_v4, 127  ;;  %vm297_vm4 = vcmask 1043456   ;;  %s1755_s0 = smov 96  }
   0x8   :  { %v178_v42 = vperm.slane %v1905_v38, 0  ;;  %v179_v43 = vperm.slane %v1905_v38, 1  ;;  %v1917_v52 = vld [vmem:[%s2519_s3 + $0x6] sm:$0x3]  ;;  %v1928_v57 = vld [vmem:[%s2519_s3 + $0x4] sm:$0x3] }
   0x9   :  { %vm156_vm5 = vcmp.lt.s32.totalorder %v1836_v4, 1  ;;  %v160_v61 = vperm.slane %v1917_v52, 0  ;;  %v2531_v62 = vperm.slane %v1917_v52, 1  ;;  %vm140_vm6 = vcmp.lt.s32.totalorder %v1836_v4, 15  ;;  %s1756_s18 = smov 64  }
   0xa   :  { %v144_v2 = vperm.slane %v1928_v57, 0  ;;  %vm108_vm7 = vcmp.lt.s32.totalorder %v1836_v4, 17  ;;  %vm124_vm8 = vcmp.lt.s32.totalorder %v1836_v4, 16  ;;  %vm293_vm9 = vcmask 588800  }
   0xb   :  { %188 = vrot.lane.b32.xlu1 %v101_v1, %s1744_s15  ;;  %220 = vrot.lane.b32.xlu0 %v101_v1, %s1745_s16  ;;  %vm342_vm10 = vcmp.lt.s32.totalorder %v1836_v4, 126  ;;  %vm351_vm11 = vcmp.lt.s32.totalorder %v1836_v4, 124  ;;  %vm368_vm12 = vcmp.lt.s32.totalorder %v1836_v4, 96  ;;  %vm377_vm13 = vcmp.lt.s32.totalorder %v1836_v4, 64 }
   0xc   :  { %204 = vrot.lane.b32.xlu2 %v101_v1, %s1746_s17  ;;  %v1882_v28 = vld [vmem:[#allocation2 + $0x20] sm:$0xf]  ;;  %v1884_v29 = vld [vmem:[#allocation2 + $0x24] sm:$0xf]  ;;  %vm511_vm14 = vcmask 1041408   ;;  %vm507_vm15 = vcmask 31744  }
   0xd   :  { %917 = vst [vmem:[#allocation2 + $0x20] sm:$0xff] %v916_v25 }
  0x13   :  { %172 = vrot.lane.b32.xlu1 %v101_v1, %s1747_s20  ;;  %170 = vrot.lane.b32.xlu0 %v100_v0, %s1747_s20 }
  0x14   :  { %136 = vrot.lane.b32.xlu2 %v100_v0, %s1748_s21 }
  0x1b   :  { %152 = vrot.lane.b32.xlu1 %v100_v0, %s1749_s22  ;;  %138 = vrot.lane.b32.xlu0 %v101_v1, %s1748_s21 }
  0x1c   :  { %154 = vrot.lane.b32.xlu2 %v101_v1, %s1749_s22 }
  0x23   :  { %104 = vrot.lane.b32.xlu1 %v101_v1, %s1750_s23  ;;  %102 = vrot.lane.b32.xlu0 %v100_v0, %s1750_s23 }
  0x24   :  { %120 = vrot.lane.b32.xlu2 %v100_v0, %s1751_s24 }
  0x2b   :  { %122 = vrot.lane.b32.xlu0 %v101_v1, %s1751_s24 }
  0x5e   :  { %v203_v3 = vpop.permute.xlu2 %202 }
  0x66   :  { %v205_v8 = vpop.permute.xlu2 %204 }
  0x67   :  { %v207_v9 = vsel %vm206_vm0, %v203_v3, %v205_v8  ;;  %v208_v10 = vsel %vm206_vm0, %v205_v8, %v203_v3  ;;  %v145_v3 = vperm.slane %v1928_v57, 1 }
  0x68   :  { %v214_v11 = vmul.f32 %v210_v6, %v207_v9  ;;  %v215_v12 = vmul.f32 %v211_v7, %v208_v10 }
  0x6a   :  { %v216_v13 = vpack.c.bf16 %v215_v12, %v214_v11 }
  0x6c   :  { %217 = vst [vmem:[#allocation2 + $0x38] sm:$0xff] %v216_v13 }
  0x6e   :  { %v137_v41 = vpop.permute.xlu2 %136 }
  0x73   :  { %v1607_v58 = vld [vmem:[#allocation2 + $0x34] sm:$0xf0]  ;;  %v1450_v59 = vld [vmem:[#allocation2 + $0x38] sm:$0xf0] }
  0x75   :  { %v187_v15 = vpop.permute.xlu1 %186  ;;  %v219_v16 = vpop.permute.xlu0 %218 }
  0x76   :  { %v155_v1 = vpop.permute.xlu2 %154 }
  0x7d   :  { %v189_v26 = vpop.permute.xlu1 %188  ;;  %v221_v27 = vpop.permute.xlu0 %220 }
  0x7e   :  { %v191_v30 = vsel %vm190_vm1, %v187_v15, %v189_v26  ;;  %v192_v31 = vsel %vm190_vm1, %v189_v26, %v187_v15  ;;  %v223_v32 = vsel %vm222_vm2, %v219_v16, %v221_v27  ;;  %v224_v33 = vsel %vm222_vm2, %v221_v27, %v219_v16 }
  0x7f   :  { %v198_v34 = vmul.f32 %v194_v19, %v191_v30  ;;  %v199_v35 = vmul.f32 %v195_v20, %v192_v31  ;;  %v230_v36 = vmul.f32 %v226_v21, %v223_v32  ;;  %v231_v37 = vmul.f32 %v227_v22, %v224_v33  ;;  %v1955_v30 = vld [vmem:[%s2519_s3] sm:$0x3] }
  0x80   :  { %v38_v31 = vld [vmem:[%s2518_s2] sm:$0xff] }
  0x81   :  { %v200_v39 = vpack.c.bf16 %v199_v35, %v198_v34  ;;  %v232_v40 = vpack.c.bf16 %v231_v37, %v230_v36  ;;  %v1752_v34 = vmov 0   ;;  %v2528_v37 = vperm.slane %v1955_v30, 0 }
  0x82   :  { %1631 = vset.pattern.permute.xlu1 %v1752_v34  ;;  %1663 = vset.pattern.permute.xlu0 %v1752_v34 }
  0x83   :  { %201 = vst [vmem:[#allocation2 + $0x30] sm:$0xff] %v200_v39  ;;  %v273_v44 = vunpack.c.l.b16 %v232_v40  ;;  %v274_v45 = vunpack.c.h.b16 %v232_v40  ;;  %245 = vperm.xlu1 %1631, %v38_v31   ;;  %1662 = vset.pattern.permute.xlu2 %v1752_v34  ;;  %v2527_v39 = vperm.slane %v1955_v30, 1 }
  0x85   :  { %v173_v46 = vpop.permute.xlu1 %172  ;;  %v171_v47 = vpop.permute.xlu0 %170  ;;  %v283_v48 = vpack.c.b16 %v273_v44, %v273_v44  ;;  %v284_v49 = vpack.c.b16 %v274_v45, %v274_v45 }
  0x86   :  { %v175_v50 = vsel %vm174_vm3, %v171_v47, %v173_v46  ;;  %v176_v51 = vsel %vm174_vm3, %v173_v46, %v171_v47 }
  0x87   :  { %v182_v53 = vmul.f32 %v178_v42, %v175_v50  ;;  %v183_v54 = vmul.f32 %v179_v43, %v176_v51  ;;  %v299_v55 = vsel %vm297_vm4, %v283_v48, 0  ;;  %v302_v56 = vsel %vm297_vm4, %v284_v49, 0 }
  0x88   :  { %307 = vmatpush.bf16.msra.mxu0 %v299_v55  ;;  %320 = vmatpush.bf16.msra.mxu1 %v302_v56 }
  0x89   :  { %v184_v60 = vpack.c.bf16 %v183_v54, %v182_v53  ;;  %v121_v54 = vpop.permute.xlu2 %120 }
  0x8a   :  { %v1448_v63 = vld [vmem:[#allocation2 + $0x30] sm:$0xf]  ;;  %v1606_v0 = vld [vmem:[#allocation2 + $0x34] sm:$0xf] }
  0x8b   :  { %185 = vst [vmem:[#allocation2 + $0x28] sm:$0xff] %v184_v60  ;;  %v1449_v8 = vor.u32 %v1607_v58, %v1448_v63  ;;  %v1453_v9 = vor.u32 %v1606_v0, %v1450_v59 }
  0x8d   :  { %v153_v10 = vpop.permute.xlu1 %152  ;;  %v139_v11 = vpop.permute.xlu0 %138  ;;  %308 = vmatpush.bf16.msra.mxu0 %v1449_v8  ;;  %321 = vmatpush.bf16.msra.mxu1 %v1453_v9 }
  0x8e   :  { %v157_v12 = vsel %vm156_vm5, %v153_v10, %v155_v1  ;;  %v158_v13 = vsel %vm156_vm5, %v155_v1, %v153_v10  ;;  %v141_v14 = vsel %vm140_vm6, %v137_v41, %v139_v11  ;;  %v142_v15 = vsel %vm140_vm6, %v139_v11, %v137_v41 }
  0x8f   :  { %v164_v16 = vmul.f32 %v160_v61, %v158_v13  ;;  %v165_v25 = vmul.f32 %v2531_v62, %v157_v12  ;;  %v148_v26 = vmul.f32 %v144_v2, %v142_v15  ;;  %v149_v27 = vmul.f32 %v145_v3, %v141_v14 }
  0x91   :  { %v166_v32 = vpack.c.bf16 %v165_v25, %v164_v16  ;;  %v150_v33 = vpack.c.bf16 %v149_v27, %v148_v26  ;;  %v1992_v25 = vld [vmem:[%s2517_s1] sm:$0xf]  ;;  %s1753_s1 = smov 126  }
  0x92   :  { %v1605_v35 = vld [vmem:[#allocation2 + $0x24] sm:$0xf0]  ;;  %v1442_v36 = vld [vmem:[#allocation2 + $0x28] sm:$0xf0] }
  0x93   :  { %167 = vst [vmem:[#allocation2 + $0x18] sm:$0xff] %v166_v32  ;;  %v1441_v40 = vor.u32 %v1605_v35, %v1882_v28  ;;  %v1445_v41 = vor.u32 %v1884_v29, %v1442_v36  ;;  %v1976_v28 = vld [vmem:[%s2519_s3 + $0x2] sm:$0x3] }
  0x94   :  { %151 = vst [vmem:[#allocation2 + $0x10] sm:$0xff] %v150_v33  ;;  %v2530_v50 = vperm.slane %v1976_v28, 0  ;;  %v2529_v55 = vperm.slane %v1976_v28, 1 }
  0x95   :  { %v105_v44 = vpop.permute.xlu1 %104  ;;  %v103_v45 = vpop.permute.xlu0 %102  ;;  %309 = vmatpush.bf16.msra.mxu0 %v1441_v40  ;;  %322 = vmatpush.bf16.msra.mxu1 %v1445_v41 }
  0x96   :  { %v109_v46 = vsel %vm108_vm7, %v103_v45, %v105_v44  ;;  %v110_v47 = vsel %vm108_vm7, %v105_v44, %v103_v45 }
  0x97   :  { %v116_v48 = vmul.f32 %v2528_v37, %v110_v47  ;;  %v117_v49 = vmul.f32 %v2527_v39, %v109_v46 }
  0x99   :  { %v118_v29 = vpack.c.bf16 %v117_v49, %v116_v48 }
  0x9a   :  { %v1603_v51 = vld [vmem:[#allocation2 + $0x14] sm:$0xf0]  ;;  %v1434_v53 = vld [vmem:[#allocation2 + $0x18] sm:$0xf0] }
  0x9b   :  { %119 = vst [vmem:[#allocation2] sm:$0xff] %v118_v29  ;;  %v1432_v56 = vld [vmem:[#allocation2 + $0x10] sm:$0xf]  ;;  %v1602_v58 = vld [vmem:[#allocation2 + $0x14] sm:$0xf] }
  0x9c   :  { %v1433_v59 = vor.u32 %v1603_v51, %v1432_v56  ;;  %v1437_v60 = vor.u32 %v1602_v58, %v1434_v53 }
  0x9d   :  { %v123_v63 = vpop.permute.xlu0 %122 }
  0x9e   :  { %v125_v0 = vsel %vm124_vm8, %v121_v54, %v123_v63  ;;  %v126_v1 = vsel %vm124_vm8, %v123_v63, %v121_v54  ;;  %310 = vmatpush.bf16.msra.mxu0 %v1433_v59  ;;  %323 = vmatpush.bf16.msra.mxu1 %v1437_v60 }
  0x9f   :  { %v132_v8 = vmul.f32 %v2530_v50, %v126_v1  ;;  %v133_v9 = vmul.f32 %v2529_v55, %v125_v0 }
  0xa1   :  { %v134_v10 = vpack.c.bf16 %v133_v9, %v132_v8 }
  0xa2   :  { %v1424_v11 = vld [vmem:[#allocation2] sm:$0xf]  ;;  %v1600_v13 = vld [vmem:[#allocation2 + $0x4] sm:$0xf] }
  0xa3   :  { %135 = vst [vmem:[#allocation2 + $0x8] sm:$0xff] %v134_v10 }
  0xaa   :  { %v1601_v12 = vld [vmem:[#allocation2 + $0x4] sm:$0xf0]  ;;  %v1426_v14 = vld [vmem:[#allocation2 + $0x8] sm:$0xf0] }
  0xab   :  { %v1425_v15 = vor.u32 %v1601_v12, %v1424_v11  ;;  %v1429_v16 = vor.u32 %v1600_v13, %v1426_v14 }
  0xad   :  { %311 = vmatpush.bf16.msra.mxu0 %v1425_v15  ;;  %324 = vmatpush.bf16.msra.mxu1 %v1429_v16 }
  0xb0   :  { %1454 = vmatmul.msk.bf16.vlgmr.msra.gmra.mxu0 %vm293_vm9, %v1992_v25  ;;  %1455 = vmatmul.msk.bf16.vlgmr.msra.gmra.mxu1 %vm293_vm9, %v1992_v25 }
  0xf5   :  { %v1998_v26 = vpop.permute.xlu1 %245 }
 0x12d   :  { %v313_v27 = vpop.f32.mrf.mxu0  ;;  %v326_v31 = vpop.f32.mrf.mxu1 }
 0x12e   :  { %v2001_v32 = vadd.f32 %v313_v27, %v1998_v26  ;;  %v2004_v33 = vadd.f32 %v326_v31, %v1998_v26 }
 0x130   :  { %v1632_v34 = vpack.i.bf16 %v2004_v33, %v2001_v32  ;;  %v779_v35 = vmul.f32 0.044715, %v2001_v32  ;;  %v780_v36 = vmul.f32 0.044715, %v2004_v33  ;;  %v777_v56 = vmul.f32 0.5, %v2001_v32 }
 0x131   :  { %v778_v59 = vmul.f32 0.5, %v2004_v33 }
 0x132   :  { %1633 = vrot.lane.b32.xlu2 %v1632_v34, %s1747_s20  ;;  %v781_v40 = vmul.f32 %v779_v35, %v2001_v32  ;;  %v782_v41 = vmul.f32 %v780_v36, %v2004_v33 }
 0x134   :  { %v783_v44 = vmul.f32 %v781_v40, %v2001_v32  ;;  %v784_v47 = vmul.f32 %v782_v41, %v2004_v33 }
 0x135   :  { %v315_v45 = vpop.f32.mrf.mxu0  ;;  %v328_v46 = vpop.f32.mrf.mxu1 }
 0x136   :  { %v785_v48 = vadd.f32 %v783_v44, %v2001_v32  ;;  %v786_v49 = vadd.f32 %v784_v47, %v2004_v33 }
 0x138   :  { %v787_v29 = vmul.f32 0.7978846, %v785_v48  ;;  %v788_v51 = vmul.f32 0.7978846, %v786_v49 }
 0x13a   :  { %1694 = vtanh.f32 %v787_v29 }
 0x13b   :  { %1696 = vtanh.f32 %v788_v51 }
 0x140   :  { %v1695_v53 = vpop.eup %1694 }
 0x141   :  { %v1697_v54 = vpop.eup %1696  ;;  %v791_v58 = vadd.f32 1.0, %v1695_v53 }
 0x142   :  { %v792_v60 = vadd.f32 1.0, %v1697_v54 }
 0x143   :  { %v793_v63 = vmul.f32 %v791_v58, %v777_v56 }
 0x144   :  { %v794_v0 = vmul.f32 %v792_v60, %v778_v59 }
 0x146   :  { %v795_v1 = vpack.c.bf16 %v794_v0, %v793_v63 }
 0x148   :  { %v1531_v8 = vrot.slane %v795_v1, 9 }
 0x14a   :  { %800 = vst [vmem:[#allocation3] sm:$0x77] %v1531_v8 }
 0x18c   :  { %v1634_v9 = vpop.permute.xlu2 %1633 }
 0x18d   :  { %v1636_v10 = vunpack.i.h.bf16 %v1634_v9  ;;  %v1635_v11 = vunpack.i.l.bf16 %v1634_v9 }
 0x18f   :  { %v334_v12 = vsel %vm174_vm3, %v1635_v11, %v1636_v10  ;;  %v335_v13 = vsel %vm174_vm3, %v1636_v10, %v1635_v11 }
 0x190   :  { %v336_v14 = vmax.f32 %v2001_v32, %v334_v12  ;;  %v337_v15 = vmax.f32 %v2004_v33, %v335_v13 }
 0x192   :  { %v1637_v16 = vpack.i.bf16 %v337_v15, %v336_v14 }
 0x194   :  { %1638 = vrot.lane.b32.xlu0 %v1637_v16, %s1753_s1  ;;  %v88_v16 = vld [vmem:[%s2522_s6] sm:$0x3] }
 0x206   :  { %v1639_v27 = vpop.permute.xlu0 %1638 }
 0x207   :  { %v1641_v31 = vunpack.i.h.bf16 %v1639_v27  ;;  %v1640_v34 = vunpack.i.l.bf16 %v1639_v27  ;;  %v91_v27 = vld [vmem:[%s2522_s6 + $0x6] sm:$0x3] }
 0x209   :  { %v343_v35 = vsel %vm342_vm10, %v1640_v34, %v1641_v31  ;;  %v344_v36 = vsel %vm342_vm10, %v1641_v31, %v1640_v34  ;;  %v2062_v31 = vld [vmem:[%s2520_s4 + $0x38] sm:$0xff] }
 0x20a   :  { %v345_v40 = vmax.f32 %v336_v14, %v343_v35  ;;  %v346_v41 = vmax.f32 %v337_v15, %v344_v36  ;;  %v2067_v34 = vld [vmem:[%s2520_s4 + $0x78] sm:$0xff]  ;;  %480 = vmatpush.bf16.msra.mxu2 %v2062_v31  ;;  %v2074_v35 = vld [vmem:[%s2520_s4 + $0x30] sm:$0xff] }
 0x20b   :  { %493 = vmatpush.bf16.msra.mxu3 %v2067_v34  ;;  %v2079_v36 = vld [vmem:[%s2520_s4 + $0x70] sm:$0xff] }
 0x20c   :  { %v1642_v44 = vpack.i.bf16 %v346_v41, %v345_v40 }
 0x20e   :  { %1643 = vrot.lane.b32.xlu1 %v1642_v44, %s1754_s14  ;;  %481 = vmatpush.bf16.msra.mxu2 %v2074_v35  ;;  %v2100_v44 = vld [vmem:[%s2520_s4 + $0x20] sm:$0xff] }
 0x20f   :  { %494 = vmatpush.bf16.msra.mxu3 %v2079_v36 }
 0x280   :  { %v1644_v45 = vpop.permute.xlu1 %1643 }
 0x281   :  { %v1646_v46 = vunpack.i.h.bf16 %v1644_v45  ;;  %v1645_v47 = vunpack.i.l.bf16 %v1644_v45  ;;  %v2105_v45 = vld [vmem:[%s2520_s4 + $0x60] sm:$0xff] }
 0x283   :  { %v352_v48 = vsel %vm351_vm11, %v1645_v47, %v1646_v46  ;;  %v353_v49 = vsel %vm351_vm11, %v1646_v46, %v1645_v47  ;;  %v2112_v46 = vld [vmem:[%s2520_s4 + $0x18] sm:$0xff] }
 0x284   :  { %v354_v29 = vmax.f32 %v345_v40, %v352_v48  ;;  %v355_v51 = vmax.f32 %v346_v41, %v353_v49  ;;  %v2086_v40 = vld [vmem:[%s2520_s4 + $0x28] sm:$0xff]  ;;  %v2117_v47 = vld [vmem:[%s2520_s4 + $0x58] sm:$0xff]  ;;  %v2126_v48 = vld [vmem:[%s2520_s4 + $0x10] sm:$0xff] }
 0x285   :  { %v2091_v41 = vld [vmem:[%s2520_s4 + $0x68] sm:$0xff]  ;;  %482 = vmatpush.bf16.msra.mxu2 %v2086_v40  ;;  %v2131_v49 = vld [vmem:[%s2520_s4 + $0x50] sm:$0xff] }
 0x286   :  { %v1647_v53 = vpack.i.bf16 %v355_v51, %v354_v29  ;;  %495 = vmatpush.bf16.msra.mxu3 %v2091_v41 }
 0x288   :  { %1648 = vrot.lane.b32.xlu2 %v1647_v53, %s1746_s17  ;;  %v2152_v53 = vld [vmem:[%s2520_s4 + $0x48] sm:$0xff] }
 0x289   :  { %483 = vmatpush.bf16.msra.mxu2 %v2100_v44 }
 0x28a   :  { %496 = vmatpush.bf16.msra.mxu3 %v2105_v45 }
 0x28d   :  { %484 = vmatpush.bf16.msra.mxu2 %v2112_v46 }
 0x28e   :  { %497 = vmatpush.bf16.msra.mxu3 %v2117_v47 }
 0x290   :  { %948 = vrot.lane.b32.xlu2 %v1873_v23, %s1745_s16 }
 0x291   :  { %485 = vmatpush.bf16.msra.mxu2 %v2126_v48 }
 0x292   :  { %498 = vmatpush.bf16.msra.mxu3 %v2131_v49 }
 0x296   :  { %499 = vmatpush.bf16.msra.mxu3 %v2152_v53 }
 0x2e2   :  { %v1649_v54 = vpop.permute.xlu2 %1648 }
 0x2e3   :  { %v1651_v56 = vunpack.i.h.bf16 %v1649_v54  ;;  %v1650_v58 = vunpack.i.l.bf16 %v1649_v54  ;;  %v2159_v54 = vld [vmem:[%s2520_s4] sm:$0xff] }
 0x2e5   :  { %v360_v59 = vsel %vm206_vm0, %v1650_v58, %v1651_v56  ;;  %v361_v60 = vsel %vm206_vm0, %v1651_v56, %v1650_v58  ;;  %v2164_v56 = vld [vmem:[%s2520_s4 + $0x40] sm:$0xff] }
 0x2e6   :  { %v362_v63 = vmax.f32 %v354_v29, %v360_v59  ;;  %v363_v0 = vmax.f32 %v355_v51, %v361_v60  ;;  %v96_v29 = vld [vmem:[%s2522_s6 + $0x10] sm:$0x3]  ;;  %v2147_v51 = vld [vmem:[%s2520_s4 + $0x8] sm:$0xff]  ;;  %500 = vmatpush.bf16.msra.mxu3 %v2164_v56 }
 0x2e7   :  { %486 = vmatpush.bf16.msra.mxu2 %v2147_v51 }
 0x2e8   :  { %v1652_v1 = vpack.i.bf16 %v363_v0, %v362_v63 }
 0x2ea   :  { %1653 = vrot.lane.b32.xlu0 %v1652_v1, %s1755_s0 }
 0x2eb   :  { %487 = vmatpush.bf16.msra.mxu2 %v2159_v54 }
 0x2f2   :  { %950 = vrot.lane.b32.xlu0 %v1878_v24, %s1745_s16 }
 0x35c   :  { %v1654_v8 = vpop.permute.xlu0 %1653 }
 0x35d   :  { %v1656_v9 = vunpack.i.h.bf16 %v1654_v8  ;;  %v1655_v10 = vunpack.i.l.bf16 %v1654_v8 }
 0x35f   :  { %v369_v11 = vsel %vm368_vm12, %v1655_v10, %v1656_v9  ;;  %v370_v12 = vsel %vm368_vm12, %v1656_v9, %v1655_v10 }
 0x360   :  { %v371_v13 = vmax.f32 %v362_v63, %v369_v11  ;;  %v372_v14 = vmax.f32 %v363_v0, %v370_v12  ;;  %v90_v11 = vld [vmem:[%s2522_s6 + $0x4] sm:$0x3]  ;;  %v89_v12 = vld [vmem:[%s2522_s6 + $0x2] sm:$0x3] }
 0x361   :  { %576 = vperm.xlu0 %1663, %v90_v11   ;;  %553 = vperm.xlu2 %1662, %v89_v12  }
 0x362   :  { %v1657_v15 = vpack.i.bf16 %v372_v14, %v371_v13 }
 0x364   :  { %1658 = vrot.lane.b32.xlu1 %v1657_v15, %s1756_s18  ;;  %v80_v15 = vld [vmem:[%s2521_s5 + $0x2] sm:$0x3] }
 0x369   :  { %938 = vrot.lane.b32.xlu0 %v1873_v23, %s1746_s17 }
 0x36c   :  { %530 = vperm.xlu1 %1631, %v88_v16  }
 0x374   :  { %599 = vperm.xlu1 %1631, %v91_v27   ;;  %v2194_v27 = vsel %vm511_vm14, %v80_v15, 0  ;;  %v93_v15 = vld [vmem:[%s2522_s6 + $0xa] sm:$0x3] }
 0x375   :  { %545 = vmatpush.bf16.msrb.mxu1 %v2194_v27 }
 0x37c   :  { %928 = vrot.lane.b32.xlu1 %v1873_v23, %s1744_s15 }
 0x384   :  { %940 = vrot.lane.b32.xlu1 %v1878_v24, %s1746_s17 }
 0x38c   :  { %918 = vrot.lane.b32.xlu1 %v1873_v23, %s1747_s20 }
 0x394   :  { %714 = vperm.xlu1 %1631, %v96_v29   ;;  %v81_v29 = vld [vmem:[%s2521_s5 + $0x4] sm:$0x3] }
 0x39c   :  { %906 = vrot.lane.b32.xlu1 %v1873_v23, %s1749_s22 }
 0x3a4   :  { %878 = vrot.lane.b32.xlu1 %v1878_v24, %s1750_s23 }
 0x3d6   :  { %v1659_v58 = vpop.permute.xlu1 %1658 }
 0x3d7   :  { %v1661_v59 = vunpack.i.h.bf16 %v1659_v58  ;;  %v1660_v60 = vunpack.i.l.bf16 %v1659_v58  ;;  %v82_v58 = vld [vmem:[%s2521_s5 + $0x6] sm:$0x3] }
 0x3d9   :  { %v378_v63 = vsel %vm377_vm13, %v1660_v60, %v1661_v59  ;;  %v379_v0 = vsel %vm377_vm13, %v1661_v59, %v1660_v60  ;;  %v2205_v59 = vsel %vm511_vm14, %v81_v29, 0  ;;  %v2208_v60 = vsel %vm511_vm14, %v82_v58, 0 }
 0x3da   :  { %v380_v1 = vmax.f32 %v371_v13, %v378_v63  ;;  %v381_v8 = vmax.f32 %v372_v14, %v379_v0  ;;  %v94_v13 = vld [vmem:[%s2522_s6 + $0xc] sm:$0x3]  ;;  %v79_v14 = vld [vmem:[%s2521_s5] sm:$0x3]  ;;  %v92_v63 = vld [vmem:[%s2522_s6 + $0x8] sm:$0x3]  ;;  %568 = vmatpush.bf16.msrb.mxu2 %v2205_v59  ;;  %591 = vmatpush.bf16.msrb.mxu3 %v2208_v60 }
 0x3db   :  { %668 = vperm.xlu0 %1663, %v94_v13   ;;  %v2191_v16 = vsel %vm511_vm14, %v79_v14, 0  ;;  %v95_v0 = vld [vmem:[%s2522_s6 + $0xe] sm:$0x3]  ;;  %622 = vperm.xlu2 %1662, %v92_v63  }
 0x3dc   :  { %v382_v9 = vpack.c.bf16 %v380_v1, %v380_v1  ;;  %v383_v10 = vpack.c.bf16 %v381_v8, %v381_v8  ;;  %522 = vmatpush.bf16.msrb.mxu0 %v2191_v16  ;;  %v83_v1 = vld [vmem:[%s2521_s5 + $0x8] sm:$0x3]  ;;  %v84_v8 = vld [vmem:[%s2521_s5 + $0xa] sm:$0x3]  ;;  %v86_v13 = vld [vmem:[%s2521_s5 + $0xe] sm:$0x3] }
 0x3dd   :  { %v2231_v11 = vsel %vm511_vm14, %v84_v8, 0  ;;  %v2242_v14 = vsel %vm511_vm14, %v86_v13, 0  ;;  %v951_v13 = vpop.permute.xlu0 %950 }
 0x3de   :  { %488 = vmatmul.bf16.vlgmr.msra.gmra.mxu2 %v382_v9  ;;  %501 = vmatmul.bf16.vlgmr.msra.gmra.mxu3 %v383_v10  ;;  %v85_v9 = vld [vmem:[%s2521_s5 + $0xc] sm:$0x3]  ;;  %v2228_v10 = vsel %vm511_vm14, %v83_v1, 0  ;;  %v2280_v55 = vpop.permute.xlu1 %530 }
 0x3df   :  { %v2234_v12 = vsel %vm511_vm14, %v85_v9, 0  ;;  %637 = vmatpush.bf16.msra.mxu1 %v2231_v11  ;;  %683 = vmatpush.bf16.msra.mxu3 %v2242_v14  ;;  %v949_v9 = vpop.permute.xlu2 %948 }
 0x3e0   :  { %614 = vmatpush.bf16.msra.mxu0 %v2228_v10  ;;  %660 = vmatpush.bf16.msra.mxu2 %v2234_v12 }
 0x3e3   :  { %691 = vperm.xlu0 %1663, %v95_v0   ;;  %930 = vrot.lane.b32.xlu2 %v1878_v24, %s1744_s15  ;;  %v87_v0 = vld [vmem:[%s2521_s5 + $0x10] sm:$0x3] }
 0x3e4   :  { %v2263_v8 = vsel %vm511_vm14, %v87_v0, 0 }
 0x3e6   :  { %v2290_v18 = vpop.permute.xlu1 %599 }
 0x3eb   :  { %898 = vrot.lane.b32.xlu0 %v1878_v24, %s1748_s21  ;;  %645 = vperm.xlu2 %1662, %v93_v15   ;;  %v952_v15 = vsel %vm222_vm2, %v949_v9, %v951_v13 }
 0x3f3   :  { %876 = vrot.lane.b32.xlu0 %v1873_v23, %s1750_s23  ;;  %920 = vrot.lane.b32.xlu2 %v1878_v24, %s1747_s20 }
 0x3fb   :  { %888 = vrot.lane.b32.xlu0 %v1878_v24, %s1751_s24  ;;  %896 = vrot.lane.b32.xlu2 %v1873_v23, %s1748_s21 }
 0x403   :  { %908 = vrot.lane.b32.xlu2 %v1878_v24, %s1749_s22 }
 0x40b   :  { %886 = vrot.lane.b32.xlu2 %v1873_v23, %s1751_s24 }
 0x461   :  { %v489_v29 = vpop.f32.mrf.mxu2  ;;  %v502_v58 = vpop.f32.mrf.mxu3 }
 0x462   :  { %v503_v63 = vadd.f32 %v502_v58, %v489_v29  ;;  %v953_v29 = vsel %vm222_vm2, %v951_v13, %v949_v9  ;;  %v954_v58 = vmul.f32 %v952_v15, %v226_v21  ;;  %v929_v21 = vpop.permute.xlu1 %928 }
 0x464   :  { %v506_v1 = vpack.c.bf16 %v503_v63, %v503_v63  ;;  %v955_v63 = vmul.f32 %v953_v29, %v227_v22  ;;  %v2292_v22 = vpop.permute.xlu0 %576 }
 0x466   :  { %1520 = vmatmul.msk.bf16.vlgmr.msrb.gmra.mxu0 %vm507_vm15, %v506_v1  ;;  %1521 = vmatmul.msk.bf16.vlgmr.msrb.gmra.mxu1 %vm507_vm15, %v506_v1  ;;  %v956_v37 = vpack.c.bf16 %v955_v63, %v954_v58  ;;  %v2303_v58 = vpop.permute.xlu2 %553 }
 0x467   :  { %1522 = vmatmul.msk.bf16.vlgmr.msrb.gmra.mxu2 %vm507_vm15, %v506_v1  ;;  %1523 = vmatmul.msk.bf16.vlgmr.msrb.gmra.mxu3 %vm507_vm15, %v506_v1 }
 0x468   :  { %706 = vmatpush.bf16.msrb.mxu0 %v2263_v8  ;;  %v992_v63 = vunpack.c.l.b16 %v956_v37 }
 0x469   :  { %v491_v0 = vpop.f32.mrf.mxu2  ;;  %v504_v39 = vpop.f32.mrf.mxu3 }
 0x46a   :  { %v941_v39 = vpop.permute.xlu1 %940  ;;  %v993_v0 = vunpack.c.h.b16 %v956_v37  ;;  %v1002_v50 = vpack.c.b16 %v992_v63, %v992_v63 }
 0x46c   :  { %v939_v24 = vpop.permute.xlu0 %938  ;;  %v1003_v62 = vpack.c.b16 %v993_v0, %v993_v0 }
 0x46d   :  { %v942_v9 = vsel %vm206_vm0, %v939_v24, %v941_v39  ;;  %v943_v13 = vsel %vm206_vm0, %v941_v39, %v939_v24  ;;  %v1013_v39 = vsel %vm297_vm4, %v1002_v50, 0 }
 0x46e   :  { %v944_v15 = vmul.f32 %v942_v9, %v210_v6  ;;  %v945_v23 = vmul.f32 %v943_v13, %v211_v7  ;;  %v1016_v6 = vsel %vm297_vm4, %v1003_v62, 0  ;;  %v2310_v24 = vpop.permute.xlu2 %622 }
 0x470   :  { %v946_v29 = vpack.c.bf16 %v945_v23, %v944_v15 }
 0x472   :  { %947 = vst [vmem:[#allocation2 + $0x38] sm:$0xff] %v946_v29  ;;  %v919_v0 = vpop.permute.xlu1 %918 }
 0x476   :  { %1524 = vmatmul.msk.bf16.vlgmr.msra.gmra.mxu0 %vm507_vm15, %v506_v1  ;;  %1525 = vmatmul.msk.bf16.vlgmr.msra.gmra.mxu1 %vm507_vm15, %v506_v1  ;;  %v931_v37 = vpop.permute.xlu2 %930 }
 0x477   :  { %1526 = vmatmul.msk.bf16.vlgmr.msra.gmra.mxu2 %vm507_vm15, %v506_v1  ;;  %1527 = vmatmul.msk.bf16.vlgmr.msra.gmra.mxu3 %vm507_vm15, %v506_v1  ;;  %v932_v15 = vsel %vm190_vm1, %v929_v21, %v931_v37  ;;  %v933_v62 = vsel %vm190_vm1, %v931_v37, %v929_v21  ;;  %vm835_vm1 = vcmask 64512  }
 0x478   :  { %v934_v50 = vmul.f32 %v932_v15, %v194_v19  ;;  %v935_v23 = vmul.f32 %v933_v62, %v195_v20 }
 0x479   :  { %v1564_v15 = vld [vmem:[#allocation2 + $0x38] sm:$0xf0] }
 0x47a   :  { %v936_v29 = vpack.c.bf16 %v935_v23, %v934_v50 }
 0x47c   :  { %937 = vst [vmem:[#allocation2 + $0x30] sm:$0xff] %v936_v29 }
 0x47e   :  { %v2324_v63 = vpop.permute.xlu2 %645 }
 0x486   :  { %1528 = vmatmul.msk.bf16.vlgmr.msrb.gmra.mxu0 %vm507_vm15, %v506_v1  ;;  %v97_v1 = vld [vmem:[%s2523_s7] sm:$0xf] }
 0x487   :  { %721 = vst [vmem:[#allocation1] ss:$4 sm:$0xff] %v97_v1 }
 0x48e   :  { %v722_v5 = vld.sshfl [vmem:[#allocation1] sm:$0xff pattern:$0x73625140]  ;;  %v723_v7 = vld.sshfl [vmem:[#allocation1 + $0x8] sm:$0xff pattern:$0x73625140] }
 0x48f   :  { %v727_v9 = vsel %vm511_vm14, %v722_v5, 0  ;;  %v729_v13 = vsel %vm511_vm14, %v723_v7, 0  ;;  %1260 = vst [vmem:[#allocation1] ss:$4 sm:$0xff] %v97_v1  ;;  %v2322_v1 = vpop.permute.xlu0 %668  ;;  %v1562_v7 = vld [vmem:[#allocation2 + $0x30] sm:$0xf] }
 0x490   :  { %738 = vmatpush.bf16.msrb.mxu1 %v727_v9  ;;  %751 = vmatpush.bf16.msrb.mxu2 %v729_v13  ;;  %v1615_v9 = vld [vmem:[#allocation2 + $0x34] sm:$0xf0]  ;;  %v1614_v13 = vld [vmem:[#allocation2 + $0x34] sm:$0xf] }
 0x491   :  { %v1563_v37 = vor.u32 %v1615_v9, %v1562_v7  ;;  %v1567_v23 = vor.u32 %v1614_v13, %v1564_v15 }
 0x494   :  { %1021 = vmatpush.bf16.msra.mxu1 %v1013_v39  ;;  %1034 = vmatpush.bf16.msra.mxu2 %v1016_v6  ;;  %v921_v39 = vpop.permute.xlu2 %920 }
 0x495   :  { %v922_v5 = vsel %vm174_vm3, %v919_v0, %v921_v39  ;;  %v923_v21 = vsel %vm174_vm3, %v921_v39, %v919_v0 }
 0x496   :  { %v924_v17 = vmul.f32 %v922_v5, %v178_v42  ;;  %v925_v19 = vmul.f32 %v923_v21, %v179_v43  ;;  %v2340_v42 = vpop.permute.xlu1 %714 }
 0x497   :  { %v2326_v6 = vpop.permute.xlu0 %691 }
 0x498   :  { %v926_v20 = vpack.c.bf16 %v925_v19, %v924_v17  ;;  %1022 = vmatpush.bf16.msra.mxu1 %v1563_v37  ;;  %1035 = vmatpush.bf16.msra.mxu2 %v1567_v23  ;;  %v1612_v37 = vld [vmem:[#allocation2 + $0x24] sm:$0xf] }
 0x49a   :  { %927 = vst [vmem:[#allocation2 + $0x28] sm:$0xff] %v926_v20 }
 0x49c   :  { %v897_v62 = vpop.permute.xlu2 %896 }
 0x49e   :  { %v907_v17 = vpop.permute.xlu1 %906 }
 0x49f   :  { %v899_v50 = vpop.permute.xlu0 %898 }
 0x4a0   :  { %v900_v29 = vsel %vm140_vm6, %v897_v62, %v899_v50  ;;  %v901_v0 = vsel %vm140_vm6, %v899_v50, %v897_v62 }
 0x4a1   :  { %v902_v38 = vmul.f32 %v901_v0, %v144_v2  ;;  %v903_v43 = vmul.f32 %v900_v29, %v145_v3  ;;  %v2532_v2 = vperm.slane %v1917_v52, 1  ;;  %v1554_v3 = vld [vmem:[#allocation2 + $0x20] sm:$0xf]  ;;  %v1613_v13 = vld [vmem:[#allocation2 + $0x24] sm:$0xf0]  ;;  %v2533_v52 = vperm.slane %v1976_v28, 0 }
 0x4a2   :  { %v1555_v15 = vor.u32 %v1613_v13, %v1554_v3  ;;  %v1556_v62 = vld [vmem:[#allocation2 + $0x28] sm:$0xf0] }
 0x4a3   :  { %v904_v39 = vpack.c.bf16 %v903_v43, %v902_v38  ;;  %v1559_v50 = vor.u32 %v1612_v37, %v1556_v62 }
 0x4a4   :  { %v909_v5 = vpop.permute.xlu2 %908  ;;  %1023 = vmatpush.bf16.msra.mxu1 %v1555_v15 }
 0x4a5   :  { %905 = vst [vmem:[#allocation2 + $0x10] sm:$0xff] %v904_v39  ;;  %v910_v19 = vsel %vm156_vm5, %v907_v17, %v909_v5  ;;  %v911_v20 = vsel %vm156_vm5, %v909_v5, %v907_v17  ;;  %1036 = vmatpush.bf16.msra.mxu2 %v1559_v50  ;;  %v2534_v39 = vperm.slane %v1976_v28, 1 }
 0x4a6   :  { %v912_v7 = vmul.f32 %v911_v20, %v160_v61  ;;  %v913_v9 = vmul.f32 %v910_v19, %v2532_v2  ;;  %v879_v38 = vpop.permute.xlu1 %878  ;;  %v2535_v2 = vperm.slane %v1955_v30, 0 }
 0x4a7   :  { %v877_v21 = vpop.permute.xlu0 %876 }
 0x4a8   :  { %v914_v57 = vpack.c.bf16 %v913_v9, %v912_v7  ;;  %v880_v17 = vsel %vm108_vm7, %v877_v21, %v879_v38  ;;  %v881_v19 = vsel %vm108_vm7, %v879_v38, %v877_v21 }
 0x4a9   :  { %v882_v9 = vmul.f32 %v881_v19, %v2535_v2 }
 0x4aa   :  { %915 = vst [vmem:[#allocation2 + $0x18] sm:$0xff] %v914_v57  ;;  %v2536_v57 = vperm.slane %v1955_v30, 1 }
 0x4ac   :  { %v887_v23 = vpop.permute.xlu2 %886  ;;  %v883_v3 = vmul.f32 %v880_v17, %v2536_v57  ;;  %v1546_v15 = vld [vmem:[#allocation2 + $0x10] sm:$0xf]  ;;  %v1610_v62 = vld [vmem:[#allocation2 + $0x14] sm:$0xf] }
 0x4ae   :  { %v884_v37 = vpack.c.bf16 %v883_v3, %v882_v9 }
 0x4af   :  { %v889_v29 = vpop.permute.xlu0 %888 }
 0x4b0   :  { %v890_v0 = vsel %vm124_vm8, %v887_v23, %v889_v29  ;;  %v891_v61 = vsel %vm124_vm8, %v889_v29, %v887_v23  ;;  %885 = vst [vmem:[#allocation2] sm:$0xff] %v884_v37 }
 0x4b1   :  { %v892_v43 = vmul.f32 %v891_v61, %v2533_v52  ;;  %v893_v5 = vmul.f32 %v890_v0, %v2534_v39  ;;  %v1611_v28 = vld [vmem:[#allocation2 + $0x14] sm:$0xf0]  ;;  %v1548_v50 = vld [vmem:[#allocation2 + $0x18] sm:$0xf0] }
 0x4b2   :  { %v1547_v23 = vor.u32 %v1611_v28, %v1546_v15  ;;  %v1551_v29 = vor.u32 %v1610_v62, %v1548_v50 }
 0x4b3   :  { %v894_v13 = vpack.c.bf16 %v893_v5, %v892_v43 }
 0x4b4   :  { %1024 = vmatpush.bf16.msra.mxu1 %v1547_v23  ;;  %1037 = vmatpush.bf16.msra.mxu2 %v1551_v29 }
 0x4b5   :  { %895 = vst [vmem:[#allocation2 + $0x8] sm:$0xff] %v894_v13 }
 0x4b7   :  { %v1538_v5 = vld [vmem:[#allocation2] sm:$0xf]  ;;  %v1608_v17 = vld [vmem:[#allocation2 + $0x4] sm:$0xf] }
 0x4bc   :  { %v1609_v52 = vld [vmem:[#allocation2 + $0x4] sm:$0xf0]  ;;  %v1540_v39 = vld [vmem:[#allocation2 + $0x8] sm:$0xf0] }
 0x4bd   :  { %v1539_v19 = vor.u32 %v1609_v52, %v1538_v5  ;;  %v1543_v2 = vor.u32 %v1608_v17, %v1540_v39 }
 0x4bf   :  { %1025 = vmatpush.bf16.msra.mxu1 %v1539_v19  ;;  %1038 = vmatpush.bf16.msra.mxu2 %v1543_v2 }
 0x4e3   :  { %v524_v20 = vpop.f32.mrf.mxu0  ;;  %v547_v7 = vpop.f32.mrf.mxu1 }
 0x4e4   :  { %v533_v30 = vmul.f32 %v2280_v55, %v524_v20  ;;  %v556_v43 = vmul.f32 %v2303_v58, %v547_v7 }
 0x4e6   :  { %v557_v57 = vadd.f32 %v556_v43, %v533_v30 }
 0x4ea   :  { %v570_v21 = vpop.f32.mrf.mxu2  ;;  %v593_v0 = vpop.f32.mrf.mxu3 }
 0x4eb   :  { %v526_v61 = vpop.f32.mrf.mxu0  ;;  %v549_v38 = vpop.f32.mrf.mxu1  ;;  %v579_v9 = vmul.f32 %v2292_v22, %v570_v21  ;;  %v602_v28 = vmul.f32 %v2290_v18, %v593_v0 }
 0x4ed   :  { %v580_v62 = vadd.f32 %v579_v9, %v557_v57 }
 0x4ef   :  { %v603_v50 = vadd.f32 %v602_v28, %v580_v62 }
 0x4f2   :  { %v572_v3 = vpop.f32.mrf.mxu2  ;;  %v595_v13 = vpop.f32.mrf.mxu3 }
 0x4f3   :  { %v616_v37 = vpop.f32.mrf.mxu0  ;;  %v639_v15 = vpop.f32.mrf.mxu1 }
 0x4f4   :  { %v625_v20 = vmul.f32 %v2310_v24, %v616_v37  ;;  %v648_v21 = vmul.f32 %v2324_v63, %v639_v15 }
 0x4f6   :  { %v626_v7 = vadd.f32 %v625_v20, %v603_v50 }
 0x4f8   :  { %v649_v39 = vadd.f32 %v648_v21, %v626_v7 }
 0x4fa   :  { %v662_v23 = vpop.f32.mrf.mxu2  ;;  %v685_v29 = vpop.f32.mrf.mxu3 }
 0x4fb   :  { %v618_v61 = vpop.f32.mrf.mxu0  ;;  %v641_v38 = vpop.f32.mrf.mxu1  ;;  %v671_v52 = vmul.f32 %v2322_v1, %v662_v23  ;;  %v694_v43 = vmul.f32 %v2326_v6, %v685_v29 }
 0x4fd   :  { %v672_v30 = vadd.f32 %v671_v52, %v649_v39 }
 0x4ff   :  { %v695_v0 = vadd.f32 %v694_v43, %v672_v30 }
 0x502   :  { %v664_v5 = vpop.f32.mrf.mxu2  ;;  %v687_v17 = vpop.f32.mrf.mxu3 }
 0x503   :  { %v708_v19 = vpop.f32.mrf.mxu0 }
 0x504   :  { %v717_v2 = vmul.f32 %v2340_v42, %v708_v19 }
 0x506   :  { %v718_v9 = vadd.f32 %v717_v2, %v695_v0 }
 0x508   :  { %v719_v57 = vpack.c.bf16 %v718_v9, %v718_v9 }
 0x50a   :  { %1529 = vmatmul.msk.bf16.vlgmr.msrb.gmra.mxu1 %vm507_vm15, %v719_v57  ;;  %1530 = vmatmul.msk.bf16.vlgmr.msrb.gmra.mxu2 %vm507_vm15, %v719_v57 }
 0x50b   :  { %v710_v3 = vpop.f32.mrf.mxu0  ;;  %1131 = vmatpush.bf16.msrb.mxu1 %v2191_v16  ;;  %1146 = vmatpush.bf16.msrb.mxu2 %v2194_v27 }
 0x51a   :  { %1568 = vmatmul.msk.bf16.vlgmr.msra.gmra.mxu1 %vm293_vm9, %v1992_v25  ;;  %1569 = vmatmul.msk.bf16.vlgmr.msra.gmra.mxu2 %vm293_vm9, %v1992_v25 }
 0x51b   :  { %1161 = vmatpush.bf16.msra.mxu1 %v2205_v59  ;;  %1206 = vmatpush.bf16.msra.mxu2 %v2231_v11 }
 0x587   :  { %v740_v13 = vpop.f32.mrf.mxu1 }
 0x588   :  { %v759_v37 = vmul.f32 0.044715, %v740_v13  ;;  %v757_v59 = vmul.f32 0.5, %v740_v13 }
 0x58a   :  { %v761_v15 = vmul.f32 %v759_v37, %v740_v13 }
 0x58c   :  { %v763_v62 = vmul.f32 %v761_v15, %v740_v13 }
 0x58d   :  { %v753_v28 = vpop.f32.mrf.mxu2 }
 0x58e   :  { %v765_v20 = vadd.f32 %v763_v62, %v740_v13  ;;  %v760_v50 = vmul.f32 0.044715, %v753_v28  ;;  %v758_v2 = vmul.f32 0.5, %v753_v28 }
 0x58f   :  { %v742_v16 = vpop.f32.mrf.mxu1 }
 0x590   :  { %v767_v7 = vmul.f32 0.7978846, %v765_v20  ;;  %v762_v27 = vmul.f32 %v760_v50, %v753_v28 }
 0x592   :  { %1698 = vtanh.f32 %v767_v7  ;;  %v764_v23 = vmul.f32 %v762_v27, %v753_v28 }
 0x594   :  { %v766_v29 = vadd.f32 %v764_v23, %v753_v28 }
 0x595   :  { %v755_v61 = vpop.f32.mrf.mxu2 }
 0x596   :  { %v768_v38 = vmul.f32 0.7978846, %v766_v29 }
 0x597   :  { %v1027_v25 = vpop.f32.mrf.mxu1 }
 0x598   :  { %v1699_v21 = vpop.eup %1698  ;;  %1700 = vtanh.f32 %v768_v38  ;;  %v2390_v52 = vadd.f32 %v1027_v25, %v1998_v26 }
 0x599   :  { %v771_v11 = vadd.f32 1.0, %v1699_v21 }
 0x59a   :  { %v1318_v5 = vmul.f32 0.044715, %v2390_v52 }
 0x59b   :  { %v773_v39 = vmul.f32 %v771_v11, %v757_v59 }
 0x59d   :  { %v775_v30 = vmul.f32 %v773_v39, %v2001_v32  ;;  %v1040_v43 = vpop.f32.mrf.mxu2  ;;  %v1320_v32 = vmul.f32 %v1318_v5, %v2390_v52 }
 0x59e   :  { %v1701_v17 = vpop.eup %1700  ;;  %v2395_v19 = vadd.f32 %v1040_v43, %v1998_v26 }
 0x59f   :  { %v803_v0 = vmul.f32 0.044715, %v775_v30  ;;  %v772_v9 = vadd.f32 1.0, %v1701_v17  ;;  %v1029_v57 = vpop.f32.mrf.mxu1  ;;  %v1322_v27 = vmul.f32 %v1320_v32, %v2390_v52 }
 0x5a0   :  { %v1664_v3 = vpack.i.bf16 %v2395_v19, %v2390_v52  ;;  %v1319_v13 = vmul.f32 0.044715, %v2395_v19  ;;  %v1317_v32 = vmul.f32 0.5, %v2395_v19 }
 0x5a1   :  { %v805_v37 = vmul.f32 %v803_v0, %v775_v30  ;;  %v774_v15 = vmul.f32 %v772_v9, %v758_v2  ;;  %v1324_v25 = vadd.f32 %v1322_v27, %v2390_v52  ;;  %v801_v0 = vmul.f32 0.5, %v775_v30 }
 0x5a2   :  { %1665 = vrot.lane.b32.xlu1 %v1664_v3, %s1747_s20  ;;  %v1321_v62 = vmul.f32 %v1319_v13, %v2395_v19 }
 0x5a3   :  { %v807_v20 = vmul.f32 %v805_v37, %v775_v30  ;;  %v776_v26 = vmul.f32 %v774_v15, %v2004_v33  ;;  %v1326_v39 = vmul.f32 0.7978846, %v1324_v25 }
 0x5a4   :  { %v1323_v28 = vmul.f32 %v1321_v62, %v2395_v19 }
 0x5a5   :  { %v809_v50 = vadd.f32 %v807_v20, %v775_v30  ;;  %v804_v16 = vmul.f32 0.044715, %v776_v26  ;;  %v1042_v7 = vpop.f32.mrf.mxu2  ;;  %v802_v2 = vmul.f32 0.5, %v776_v26 }
 0x5a6   :  { %v1325_v23 = vadd.f32 %v1323_v28, %v2395_v19  ;;  %v1316_v28 = vmul.f32 0.5, %v2390_v52 }
 0x5a7   :  { %v811_v29 = vmul.f32 0.7978846, %v809_v50  ;;  %v806_v61 = vmul.f32 %v804_v16, %v776_v26 }
 0x5a8   :  { %v1327_v21 = vmul.f32 0.7978846, %v1325_v23 }
 0x5a9   :  { %v808_v38 = vmul.f32 %v806_v61, %v776_v26  ;;  %1702 = vtanh.f32 %v811_v29 }
 0x5aa   :  { %1704 = vtanh.f32 %v1327_v21 }
 0x5ab   :  { %v810_v59 = vadd.f32 %v808_v38, %v776_v26 }
 0x5ad   :  { %v812_v11 = vmul.f32 0.7978846, %v810_v59 }
 0x5af   :  { %1706 = vtanh.f32 %v812_v11  ;;  %v1703_v33 = vpop.eup %1702 }
 0x5b0   :  { %1708 = vtanh.f32 %v1326_v39  ;;  %v1705_v43 = vpop.eup %1704  ;;  %v815_v5 = vadd.f32 1.0, %v1703_v33 }
 0x5b1   :  { %v1331_v37 = vadd.f32 1.0, %v1705_v43 }
 0x5b2   :  { %v817_v3 = vmul.f32 %v815_v5, %v801_v0 }
 0x5b3   :  { %v1333_v50 = vmul.f32 %v1331_v37, %v1317_v32 }
 0x5b5   :  { %v1707_v17 = vpop.eup %1706 }
 0x5b6   :  { %v816_v9 = vadd.f32 1.0, %v1707_v17  ;;  %v1709_v57 = vpop.eup %1708  ;;  %v99_v17 = vld [vmem:[%s2525_s9] sm:$0xff]  ;;  %s1757_s9 = smov [#allocation4]  }
 0x5b7   :  { %v1330_v62 = vadd.f32 1.0, %v1709_v57 }
 0x5b8   :  { %v818_v13 = vmul.f32 %v816_v9, %v802_v2 }
 0x5b9   :  { %v1332_v16 = vmul.f32 %v1330_v62, %v1316_v28 }
 0x5ba   :  { %v819_v15 = vpack.c.bf16 %v818_v13, %v817_v3 }
 0x5bb   :  { %v1334_v7 = vpack.c.bf16 %v1333_v50, %v1332_v16 }
 0x5bc   :  { %v821_v20 = vrot.slane %v819_v15, 5 }
 0x5bd   :  { %v1581_v27 = vrot.slane %v1334_v7, 9 }
 0x5be   :  { %823 = vst [vmem:[#allocation3] sm:$0x88] %v821_v20 }
 0x5c5   :  { %v824_v23 = vld [vmem:[#allocation3] sm:$0xff] }
 0x5c6   :  { %v831_v30 = vunpack.c.l.b16 %v824_v23  ;;  %1339 = vst [vmem:[#allocation3] sm:$0x77] %v1581_v27  ;;  %v832_v26 = vunpack.c.h.b16 %v824_v23 }
 0x5c8   :  { %v833_v29 = vpack.c.b16 %v831_v30, %v831_v30  ;;  %v834_v61 = vpack.c.b16 %v832_v26, %v832_v26 }
 0x5ca   :  { %v840_v38 = vsel %vm297_vm4, %v833_v29, 0  ;;  %v843_v25 = vsel %vm297_vm4, %v834_v61, 0 }
 0x5cb   :  { %852 = vmatpush.bf16.msrb.mxu3 %v840_v38  ;;  %865 = vmatpush.bf16.msra.mxu0 %v843_v25 }
 0x5cf   :  { %1094 = vmatpush.bf16.msra.mxu3 %v2062_v31  ;;  %1107 = vmatpush.bf16.msrb.mxu0 %v2067_v34 }
 0x5d3   :  { %1095 = vmatpush.bf16.msra.mxu3 %v2074_v35  ;;  %1108 = vmatpush.bf16.msrb.mxu0 %v2079_v36 }
 0x5d7   :  { %1096 = vmatpush.bf16.msra.mxu3 %v2086_v40  ;;  %1109 = vmatpush.bf16.msrb.mxu0 %v2091_v41 }
 0x5db   :  { %1097 = vmatpush.bf16.msra.mxu3 %v2100_v44  ;;  %1110 = vmatpush.bf16.msrb.mxu0 %v2105_v45 }
 0x5df   :  { %1098 = vmatpush.bf16.msra.mxu3 %v2112_v46  ;;  %1111 = vmatpush.bf16.msrb.mxu0 %v2117_v47  ;;  %v2438_v46 = vld [vmem:[%s2524_s8] sm:$0xf] }
 0x5e0   :  { %1532 = vmatmul.msk.bf16.vlgmr.msrb.gmra.mxu3 %vm835_vm1, %v2438_v46  ;;  %1533 = vmatmul.msk.bf16.vlgmr.msra.gmra.mxu0 %vm835_vm1, %v2438_v46 }
 0x5e3   :  { %1099 = vmatpush.bf16.msra.mxu3 %v2126_v48  ;;  %1112 = vmatpush.bf16.msrb.mxu0 %v2131_v49 }
 0x5e7   :  { %1100 = vmatpush.bf16.msra.mxu3 %v2147_v51  ;;  %1113 = vmatpush.bf16.msrb.mxu0 %v2152_v53 }
 0x5eb   :  { %1101 = vmatpush.bf16.msra.mxu3 %v2159_v54  ;;  %1114 = vmatpush.bf16.msrb.mxu0 %v2164_v56 }
 0x5ef   :  { %1176 = vmatpush.bf16.msrb.mxu3 %v2208_v60  ;;  %1191 = vmatpush.bf16.msra.mxu0 %v2228_v10 }
 0x614   :  { %v1666_v31 = vpop.permute.xlu1 %1665 }
 0x615   :  { %v1668_v34 = vunpack.i.h.bf16 %v1666_v31  ;;  %v1667_v35 = vunpack.i.l.bf16 %v1666_v31 }
 0x617   :  { %v1048_v36 = vsel %vm174_vm3, %v1667_v35, %v1668_v34  ;;  %v1049_v40 = vsel %vm174_vm3, %v1668_v34, %v1667_v35 }
 0x618   :  { %v1050_v41 = vmax.f32 %v2390_v52, %v1048_v36  ;;  %v1051_v44 = vmax.f32 %v2395_v19, %v1049_v40 }
 0x61a   :  { %v1669_v45 = vpack.i.bf16 %v1051_v44, %v1050_v41 }
 0x61c   :  { %1670 = vrot.lane.b32.xlu2 %v1669_v45, %s1753_s1  ;;  %s1410_s1 = sshll.u32 %s2526_s10, 4  ;;  %s1411_s1 = int_to_ptr.hbm [resolvable:$true] %s1410_s1 }
 0x65d   :  { %v867_v2 = vpop.f32.mrf.mxu0 }
 0x663   :  { %v854_v0 = vpop.f32.mrf.mxu3 }
 0x665   :  { %v869_v57 = vpop.f32.mrf.mxu0 }
 0x66b   :  { %v856_v9 = vpop.f32.mrf.mxu3 }
 0x676   :  { %v1671_v47 = vpop.permute.xlu2 %1670 }
 0x677   :  { %v1673_v48 = vunpack.i.h.bf16 %v1671_v47  ;;  %v1672_v49 = vunpack.i.l.bf16 %v1671_v47 }
 0x679   :  { %v1056_v51 = vsel %vm342_vm10, %v1672_v49, %v1673_v48  ;;  %v1057_v53 = vsel %vm342_vm10, %v1673_v48, %v1672_v49 }
 0x67a   :  { %v1058_v54 = vmax.f32 %v1050_v41, %v1056_v51  ;;  %v1059_v56 = vmax.f32 %v1051_v44, %v1057_v53 }
 0x67c   :  { %v1674_v21 = vpack.i.bf16 %v1059_v56, %v1058_v54 }
 0x67e   :  { %1675 = vrot.lane.b32.xlu0 %v1674_v21, %s1754_s14  ;;  %s1758_s14 = smov 256  }
 0x6f0   :  { %v1676_v59 = vpop.permute.xlu0 %1675 }
 0x6f1   :  { %v1678_v11 = vunpack.i.h.bf16 %v1676_v59  ;;  %v1677_v39 = vunpack.i.l.bf16 %v1676_v59  ;;  %v1261_v59 = vld.sshfl [vmem:[#allocation1] sm:$0xff pattern:$0x73625140] }
 0x6f3   :  { %v1064_v60 = vsel %vm351_vm11, %v1677_v39, %v1678_v11  ;;  %v1065_v10 = vsel %vm351_vm11, %v1678_v11, %v1677_v39  ;;  %v1262_v11 = vld.sshfl [vmem:[#allocation1 + $0x8] sm:$0xff pattern:$0x73625140] }
 0x6f4   :  { %v1066_v33 = vmax.f32 %v1058_v54, %v1064_v60  ;;  %v1067_v43 = vmax.f32 %v1059_v56, %v1065_v10  ;;  %v1268_v60 = vsel %vm511_vm14, %v1262_v11, 0 }
 0x6f6   :  { %v1679_v5 = vpack.i.bf16 %v1067_v43, %v1066_v33 }
 0x6f8   :  { %1680 = vrot.lane.b32.xlu1 %v1679_v5, %s1746_s17  ;;  %s1408_s17 = sshll.u32 %s1757_s9, 4  ;;  %s1409_s17 = int_to_ptr.vmem [resolvable:$true] %s1408_s17 }
 0x700   :  { %827 = vperm.xlu1 %1631, %v99_v17  }
 0x76a   :  { %v1681_v3 = vpop.permute.xlu1 %1680 }
 0x76b   :  { %v1683_v13 = vunpack.i.h.bf16 %v1681_v3  ;;  %v1682_v37 = vunpack.i.l.bf16 %v1681_v3 }
 0x76d   :  { %v1072_v15 = vsel %vm206_vm0, %v1682_v37, %v1683_v13  ;;  %v1073_v32 = vsel %vm206_vm0, %v1683_v13, %v1682_v37 }
 0x76e   :  { %v1074_v62 = vmax.f32 %v1066_v33, %v1072_v15  ;;  %v1075_v20 = vmax.f32 %v1067_v43, %v1073_v32 }
 0x770   :  { %v1684_v28 = vpack.i.bf16 %v1075_v20, %v1074_v62 }
 0x772   :  { %v2463_v50 = vpop.permute.xlu1 %827  ;;  %1685 = vrot.lane.b32.xlu2 %v1684_v28, %s1755_s0 }
 0x773   :  { %v855_v16 = vadd.f32 %v854_v0, %v2463_v50  ;;  %v868_v7 = vadd.f32 %v867_v2, %v2463_v50 }
 0x775   :  { %871 = vst [vmem:[#allocation4] sm:$0xff] %v855_v16 }
 0x776   :  { %872 = vst [vmem:[#allocation4 + $0x8] sm:$0xff] %v868_v7 }
 0x7cc   :  { %v1686_v27 = vpop.permute.xlu2 %1685 }
 0x7cd   :  { %v1688_v23 = vunpack.i.h.bf16 %v1686_v27  ;;  %v1687_v30 = vunpack.i.l.bf16 %v1686_v27 }
 0x7cf   :  { %v1080_v26 = vsel %vm368_vm12, %v1687_v30, %v1688_v23  ;;  %v1081_v29 = vsel %vm368_vm12, %v1688_v23, %v1687_v30 }
 0x7d0   :  { %v1082_v61 = vmax.f32 %v1074_v62, %v1080_v26  ;;  %v1083_v38 = vmax.f32 %v1075_v20, %v1081_v29 }
 0x7d2   :  { %v1689_v25 = vpack.i.bf16 %v1083_v38, %v1082_v61 }
 0x7d4   :  { %1690 = vrot.lane.b32.xlu0 %v1689_v25, %s1756_s18 }
 0x846   :  { %v1691_v31 = vpop.permute.xlu0 %1690 }
 0x847   :  { %v1693_v34 = vunpack.i.h.bf16 %v1691_v31  ;;  %v1692_v35 = vunpack.i.l.bf16 %v1691_v31 }
 0x849   :  { %v1088_v36 = vsel %vm377_vm13, %v1692_v35, %v1693_v34  ;;  %v1089_v40 = vsel %vm377_vm13, %v1693_v34, %v1692_v35 }
 0x84a   :  { %v1090_v41 = vmax.f32 %v1082_v61, %v1088_v36  ;;  %v1091_v44 = vmax.f32 %v1083_v38, %v1089_v40 }
 0x84c   :  { %v1092_v45 = vpack.c.bf16 %v1090_v41, %v1090_v41  ;;  %v1093_v47 = vpack.c.bf16 %v1091_v44, %v1091_v44 }
 0x84e   :  { %1102 = vmatmul.bf16.vlgmr.msra.gmra.mxu3 %v1092_v45  ;;  %1115 = vmatmul.bf16.vlgmr.msrb.gmra.mxu0 %v1093_v47 }
 0x84f   :  { %1236 = vmatpush.bf16.msra.mxu3 %v2242_v14  ;;  %1251 = vmatpush.bf16.msrb.mxu0 %v2263_v8 }
 0x8cb   :  { %v1116_v48 = vpop.f32.mrf.mxu0 }
 0x8d1   :  { %v1103_v49 = vpop.f32.mrf.mxu3 }
 0x8d2   :  { %v1117_v51 = vadd.f32 %v1116_v48, %v1103_v49 }
 0x8d3   :  { %v1118_v53 = vpop.f32.mrf.mxu0 }
 0x8d4   :  { %v1120_v54 = vpack.c.bf16 %v1117_v51, %v1117_v51 }
 0x8d6   :  { %1570 = vmatmul.msk.bf16.vlgmr.msrb.gmra.mxu1 %vm507_vm15, %v1120_v54  ;;  %1571 = vmatmul.msk.bf16.vlgmr.msrb.gmra.mxu2 %vm507_vm15, %v1120_v54 }
 0x8d7   :  { %1573 = vmatmul.msk.bf16.vlgmr.msrb.gmra.mxu3 %vm507_vm15, %v1120_v54  ;;  %1574 = vmatmul.msk.bf16.vlgmr.msra.gmra.mxu0 %vm507_vm15, %v1120_v54 }
 0x8d8   :  { %1221 = vmatpush.bf16.msrb.mxu1 %v2234_v12  ;;  %v1266_v12 = vsel %vm511_vm14, %v1261_v59, 0 }
 0x8d9   :  { %v1105_v4 = vpop.f32.mrf.mxu3  ;;  %1277 = vmatpush.bf16.msrb.mxu2 %v1266_v12 }
 0x8e6   :  { %1572 = vmatmul.msk.bf16.vlgmr.msra.gmra.mxu1 %vm507_vm15, %v1120_v54  ;;  %1575 = vmatmul.msk.bf16.vlgmr.msra.gmra.mxu2 %vm507_vm15, %v1120_v54 }
 0x8e7   :  { %1577 = vmatmul.msk.bf16.vlgmr.msra.gmra.mxu3 %vm507_vm15, %v1120_v54  ;;  %1578 = vmatmul.msk.bf16.vlgmr.msrb.gmra.mxu0 %vm507_vm15, %v1120_v54 }
 0x8e8   :  { %1290 = vmatpush.bf16.msra.mxu1 %v1268_v60 }
 0x8f6   :  { %1576 = vmatmul.msk.bf16.vlgmr.msrb.gmra.mxu1 %vm507_vm15, %v1120_v54 }
 0x953   :  { %v1133_v14 = vpop.f32.mrf.mxu1 }
 0x954   :  { %v1193_v8 = vpop.f32.mrf.mxu0  ;;  %v1137_v0 = vmul.f32 %v1133_v14, %v2280_v55 }
 0x955   :  { %v1197_v28 = vmul.f32 %v1193_v8, %v2310_v24 }
 0x959   :  { %v1148_v56 = vpop.f32.mrf.mxu2 }
 0x95a   :  { %v1178_v21 = vpop.f32.mrf.mxu3  ;;  %v1152_v43 = vmul.f32 %v1148_v56, %v2303_v58 }
 0x95b   :  { %v1135_v39 = vpop.f32.mrf.mxu1  ;;  %v1182_v37 = vmul.f32 %v1178_v21, %v2290_v18 }
 0x95c   :  { %v1195_v10 = vpop.f32.mrf.mxu0  ;;  %v1153_v57 = vadd.f32 %v1152_v43, %v1137_v0 }
 0x961   :  { %v1150_v33 = vpop.f32.mrf.mxu2 }
 0x962   :  { %v1180_v5 = vpop.f32.mrf.mxu3 }
 0x963   :  { %v1163_v17 = vpop.f32.mrf.mxu1 }
 0x964   :  { %v1167_v2 = vmul.f32 %v1163_v17, %v2292_v22  ;;  %v1253_v9 = vpop.f32.mrf.mxu0 }
 0x965   :  { %v1257_v18 = vmul.f32 %v1253_v9, %v2340_v42 }
 0x966   :  { %v1168_v3 = vadd.f32 %v1167_v2, %v1153_v57 }
 0x968   :  { %v1183_v62 = vadd.f32 %v1182_v37, %v1168_v3 }
 0x969   :  { %v1208_v13 = vpop.f32.mrf.mxu2 }
 0x96a   :  { %v1238_v15 = vpop.f32.mrf.mxu3  ;;  %v1198_v16 = vadd.f32 %v1197_v28, %v1183_v62  ;;  %v1212_v58 = vmul.f32 %v1208_v13, %v2324_v63 }
 0x96b   :  { %v1165_v32 = vpop.f32.mrf.mxu1  ;;  %v1242_v30 = vmul.f32 %v1238_v15, %v2326_v6 }
 0x96c   :  { %v1255_v20 = vpop.f32.mrf.mxu0  ;;  %v1213_v23 = vadd.f32 %v1212_v58, %v1198_v16 }
 0x971   :  { %v1210_v7 = vpop.f32.mrf.mxu2 }
 0x972   :  { %v1240_v27 = vpop.f32.mrf.mxu3 }
 0x973   :  { %v1223_v55 = vpop.f32.mrf.mxu1 }
 0x974   :  { %v1227_v22 = vmul.f32 %v1223_v55, %v2322_v1 }
 0x976   :  { %v1228_v26 = vadd.f32 %v1227_v22, %v1213_v23 }
 0x978   :  { %v1243_v29 = vadd.f32 %v1242_v30, %v1228_v26 }
 0x97a   :  { %v1258_v61 = vadd.f32 %v1257_v18, %v1243_v29 }
 0x97b   :  { %v1225_v38 = vpop.f32.mrf.mxu1 }
 0x97c   :  { %v1259_v25 = vpack.c.bf16 %v1258_v61, %v1258_v61 }
 0x97e   :  { %1579 = vmatmul.msk.bf16.vlgmr.msrb.gmra.mxu2 %vm507_vm15, %v1259_v25  ;;  %1580 = vmatmul.msk.bf16.vlgmr.msra.gmra.mxu1 %vm507_vm15, %v1259_v25 }
 0x9fb   :  { %v1292_v24 = vpop.f32.mrf.mxu1 }
 0x9fc   :  { %v1299_v63 = vmul.f32 0.044715, %v1292_v24  ;;  %v1297_v49 = vmul.f32 0.5, %v1292_v24 }
 0x9fe   :  { %v1301_v31 = vmul.f32 %v1299_v63, %v1292_v24 }
 0xa00   :  { %v1303_v34 = vmul.f32 %v1301_v31, %v1292_v24 }
 0xa01   :  { %v1279_v35 = vpop.f32.mrf.mxu2 }
 0xa02   :  { %v1305_v36 = vadd.f32 %v1303_v34, %v1292_v24  ;;  %v1298_v1 = vmul.f32 0.044715, %v1279_v35  ;;  %v1296_v8 = vmul.f32 0.5, %v1279_v35 }
 0xa03   :  { %v1294_v40 = vpop.f32.mrf.mxu1 }
 0xa04   :  { %v1307_v6 = vmul.f32 0.7978846, %v1305_v36  ;;  %v1300_v41 = vmul.f32 %v1298_v1, %v1279_v35 }
 0xa06   :  { %1710 = vtanh.f32 %v1307_v6  ;;  %v1302_v42 = vmul.f32 %v1300_v41, %v1279_v35 }
 0xa08   :  { %v1304_v44 = vadd.f32 %v1302_v42, %v1279_v35 }
 0xa09   :  { %v1281_v45 = vpop.f32.mrf.mxu2 }
 0xa0a   :  { %v1306_v47 = vmul.f32 0.7978846, %v1304_v44 }
 0xa0c   :  { %v1711_v48 = vpop.eup %1710  ;;  %1712 = vtanh.f32 %v1306_v47 }
 0xa0d   :  { %v1311_v51 = vadd.f32 1.0, %v1711_v48 }
 0xa0f   :  { %v1313_v53 = vmul.f32 %v1311_v51, %v1297_v49 }
 0xa11   :  { %v1315_v54 = vmul.f32 %v1313_v53, %v2395_v19 }
 0xa12   :  { %v1713_v4 = vpop.eup %1712 }
 0xa13   :  { %v1343_v14 = vmul.f32 0.044715, %v1315_v54  ;;  %v1310_v56 = vadd.f32 1.0, %v1713_v4  ;;  %v1341_v9 = vmul.f32 0.5, %v1315_v54 }
 0xa15   :  { %v1345_v21 = vmul.f32 %v1343_v14, %v1315_v54  ;;  %v1312_v59 = vmul.f32 %v1310_v56, %v1296_v8 }
 0xa17   :  { %v1347_v11 = vmul.f32 %v1345_v21, %v1315_v54  ;;  %v1314_v39 = vmul.f32 %v1312_v59, %v2390_v52 }
 0xa19   :  { %v1349_v12 = vadd.f32 %v1347_v11, %v1315_v54  ;;  %v1342_v60 = vmul.f32 0.044715, %v1314_v39  ;;  %v1340_v57 = vmul.f32 0.5, %v1314_v39 }
 0xa1b   :  { %v1351_v10 = vmul.f32 0.7978846, %v1349_v12  ;;  %v1344_v33 = vmul.f32 %v1342_v60, %v1314_v39 }
 0xa1d   :  { %v1346_v43 = vmul.f32 %v1344_v33, %v1314_v39  ;;  %1714 = vtanh.f32 %v1351_v10 }
 0xa1f   :  { %v1348_v5 = vadd.f32 %v1346_v43, %v1314_v39 }
 0xa21   :  { %v1350_v17 = vmul.f32 0.7978846, %v1348_v5 }
 0xa23   :  { %1716 = vtanh.f32 %v1350_v17  ;;  %v1715_v0 = vpop.eup %1714 }
 0xa24   :  { %v1355_v19 = vadd.f32 1.0, %v1715_v0 }
 0xa26   :  { %v1357_v13 = vmul.f32 %v1355_v19, %v1341_v9 }
 0xa29   :  { %v1717_v2 = vpop.eup %1716 }
 0xa2a   :  { %v1354_v3 = vadd.f32 1.0, %v1717_v2 }
 0xa2c   :  { %v1356_v37 = vmul.f32 %v1354_v3, %v1340_v57 }
 0xa2e   :  { %v1358_v15 = vpack.c.bf16 %v1357_v13, %v1356_v37 }
 0xa30   :  { %v1360_v32 = vrot.slane %v1358_v15, 5 }
 0xa32   :  { %1362 = vst [vmem:[#allocation3] sm:$0x88] %v1360_v32 }
 0xa39   :  { %v1363_v52 = vld [vmem:[#allocation3] sm:$0xff] }
 0xa3a   :  { %v1365_v62 = vunpack.c.l.b16 %v1363_v52  ;;  %v1366_v20 = vunpack.c.h.b16 %v1363_v52 }
 0xa3c   :  { %v1367_v28 = vpack.c.b16 %v1365_v62, %v1365_v62  ;;  %v1368_v16 = vpack.c.b16 %v1366_v20, %v1366_v20 }
 0xa3e   :  { %v1370_v58 = vsel %vm297_vm4, %v1367_v28, 0  ;;  %v1373_v7 = vsel %vm297_vm4, %v1368_v16, 0 }
 0xa3f   :  { %1382 = vmatpush.bf16.msrb.mxu3 %v1370_v58  ;;  %1395 = vmatpush.bf16.msra.mxu0 %v1373_v7 }
 0xa42   :  { %1582 = vmatmul.msk.bf16.vlgmr.msrb.gmra.mxu3 %vm835_vm1, %v2438_v46  ;;  %1583 = vmatmul.msk.bf16.vlgmr.msra.gmra.mxu0 %vm835_vm1, %v2438_v46 }
 0xabf   :  { %v1397_v27 = vpop.f32.mrf.mxu0 }
 0xac0   :  { %v1398_v55 = vadd.f32 %v1397_v27, %v2463_v50 }
 0xac2   :  { %1403 = vst [vmem:[#allocation4 + $0x18] sm:$0xff] %v1398_v55 }
 0xac5   :  { %v1384_v23 = vpop.f32.mrf.mxu3 }
 0xac6   :  { %v1385_v22 = vadd.f32 %v1384_v23, %v2463_v50 }
 0xac7   :  { %v1399_v30 = vpop.f32.mrf.mxu0 }
 0xac8   :  { %1402 = vst [vmem:[#allocation4 + $0x10] sm:$0xff] %v1385_v22 }
 0xac9   :  { %1416 = dma.vmem_to_hbm [thread:$0]  %s1409_s17, 512, %s1411_s1, [#allocation5], %s1758_s14, %s1758_s14, %s1751_s24  }
 0xacd   :  { %v1386_v46 = vpop.f32.mrf.mxu3 }
 0xace   :  { %1742 = dma.done.wait [#allocation5], 512  }
 0xacf   :  { %1743 = vsyncadd [#allocation5], 4294966784 }
 0xad0   :  { %1421 = vsyncpa [#allocation5], 1 }

</bundles_post_ra>
